<compile_context>
chip_gen: v7x
topology: tpu7x:2x2x1
jax: 0.10.0
libtpu: 0.0.40
codegen_flags: <defaults>
</compile_context>

<pallas_src>
import functools

import jax
import jax.numpy as jnp
from jax.experimental import pallas as pl
from jax.experimental.pallas import tpu as pltpu


def ccu_atten_kernel(x_ref, w_ref, b_ref, o_ref):
    x = x_ref[...]                                   # (BB, N, F) f32 raw features
    w = w_ref[...]                                   # (F, F)  W_A.T (f32 or bf16)
    b = b_ref[...]                                   # (1, F)  f32 bias
    bb, n, f = x.shape

    # One big MXU matmul: stack the BB items along the M dimension.
    # N == 8 is exactly one sublane tile, so these reshapes are layout-free.
    x2 = x.reshape(bb * n, f)
    z = jnp.dot(x2.astype(w.dtype), w, preferred_element_type=jnp.float32)
    z = (z + b).reshape(bb, n, f)                    # (BB, N, F) f32 linear output

    # softmax over dim 0 (the N rows) of each item, folded into the reduction:
    #   ct = sum_f [ (sum_n e[n,f] * x[n,f]) / (sum_n e[n,f]) ]
    m = jnp.max(z, axis=1, keepdims=True)            # (BB, 1, F)
    e = jnp.exp(z - m)                               # (BB, N, F)
    s = jnp.sum(e, axis=1, keepdims=True)            # (BB, 1, F) softmax denominators
    num = jnp.sum(e * x, axis=1, keepdims=True)      # (BB, 1, F)
    ct = jnp.sum(num * pl.reciprocal(s, approx=True), axis=2)   # (BB, 1)
    o_ref[...] = ct


def prepare_params(w_a, b_a, mxu_dtype=jnp.bfloat16):
    """One-time (model init) parameter prep: pre-transpose W_A so the kernel does
    x @ W_A.T, and pre-cast it to the MXU feed dtype (bf16 halves the resident
    weight fetch on v6e/v7x). Bias stays f32."""
    w_t = jnp.asarray(w_a).T.astype(mxu_dtype)
    b2 = jnp.asarray(b_a).reshape(1, -1).astype(jnp.float32)
    return w_t, b2


def _pick_block_b(batch, target):
    """Largest batch block <= target that divides batch and keeps the (bb, 1)
    output block sublane-aligned (bb % 8 == 0 or bb == batch)."""
    bb = min(target, batch)
    if bb == batch:
        return bb
    bb -= bb % 8
    while bb >= 8 and batch % bb:
        bb -= 8
    return bb if bb >= 8 else batch


def ccu_atten_batched(ccu_features, w_t, b2, block_b=32):
    """ccu_features: (B, N, F) f32 — B independent CCU_Atten inputs.
    w_t: (F, F) pre-transposed weight (W_A.T), f32 or bf16. b2: (1, F) f32.
    Returns (B,) f32, one ct_CCU per item."""
    batch, n, feat = ccu_features.shape
    bb = _pick_block_b(batch, block_b)
    grid = (batch // bb,)
    out = pl.pallas_call(
        ccu_atten_kernel,
        out_shape=jax.ShapeDtypeStruct((batch, 1), jnp.float32),
        grid=grid,
        in_specs=[
            pl.BlockSpec((bb, n, feat), lambda i: (i, 0, 0)),
            pl.BlockSpec((feat, feat), lambda i: (0, 0)),   # W resident across batch
            pl.BlockSpec((1, feat), lambda i: (0, 0)),      # bias resident
        ],
        out_specs=pl.BlockSpec((bb, 1), lambda i: (i, 0)),
        compiler_params=pltpu.CompilerParams(
            dimension_semantics=("parallel",)),             # shards over 2 TCs on v7x
    )(ccu_features, w_t, b2)
    return out[:, 0]


def ccu_atten(ccu_features, w_t, b2):
    """Single-item path matching the original module signature: (N, F) -> scalar."""
    return ccu_atten_batched(ccu_features[None], w_t, b2, block_b=1)[0]


def ccu_atten_ref(ccu_features, w_a, b_a, mxu_dtype=jnp.float32):
    """Pure-JAX reference mirroring the PyTorch forward (single item)."""
    z = jnp.dot(ccu_features.astype(mxu_dtype), w_a.T.astype(mxu_dtype),
                preferred_element_type=jnp.float32) + b_a
    at = jax.nn.softmax(z, axis=0).reshape(1, -1)
    cf = ccu_features.reshape(1, -1)
    return jnp.sum(at * cf)


if __name__ == "__main__":
    # N = 8 CCU entries, F = 128 (config.CCU_Atten_features), batched B = 64.
    N, F, B = 8, 128, 64
    key = jax.random.PRNGKey(0)
    k_x, k_w, k_b = jax.random.split(key, 3)

    x_batch = jax.random.normal(k_x, (B, N, F), dtype=jnp.float32)
    bound = 1.0 / (F ** 0.5)
    w_a = jax.random.uniform(k_w, (F, F), minval=-bound, maxval=bound,
                             dtype=jnp.float32)
    b_a = jax.random.uniform(k_b, (F,), minval=-bound, maxval=bound,
                             dtype=jnp.float32)

    # References.
    ref_f32 = jax.vmap(lambda xi: ccu_atten_ref(xi, w_a, b_a, jnp.float32))(x_batch)
    ref_bf16 = jax.vmap(lambda xi: ccu_atten_ref(xi, w_a, b_a, jnp.bfloat16))(x_batch)

    # 1) Exact-semantics check: f32 MXU feed, batched kernel vs f32 reference.
    w_t32, b2 = prepare_params(w_a, b_a, mxu_dtype=jnp.float32)
    run_f32 = jax.jit(functools.partial(ccu_atten_batched, w_t=w_t32, b2=b2,
                                        block_b=32))
    out_f32 = jax.block_until_ready(run_f32(x_batch))
    assert jnp.allclose(out_f32, ref_f32, rtol=2e-3, atol=2e-3), (out_f32, ref_f32)

    # 2) Optimized path: bf16 MXU feed (f32 accumulate), vs matched-precision ref
    #    and (loosely) vs the full-f32 reference.
    w_t16, _ = prepare_params(w_a, b_a, mxu_dtype=jnp.bfloat16)
    run_bf16 = jax.jit(functools.partial(ccu_atten_batched, w_t=w_t16, b2=b2,
                                         block_b=32))
    out_bf16 = jax.block_until_ready(run_bf16(x_batch))
    assert jnp.allclose(out_bf16, ref_bf16, rtol=1e-2, atol=1e-2), (out_bf16, ref_bf16)
    assert jnp.allclose(out_bf16, ref_f32, rtol=5e-2, atol=2.5e-1), (out_bf16, ref_f32)

    # 3) Single-item path (original module interface).
    run_one = jax.jit(functools.partial(ccu_atten, w_t=w_t32, b2=b2))
    out_one = jax.block_until_ready(run_one(x_batch[0]))
    assert jnp.allclose(out_one, ref_f32[0], rtol=2e-3, atol=2e-3), (out_one, ref_f32[0])

    print("KERNEL_OK")
</pallas_src>

<mosaic_0001>
module attributes {stable_mosaic.version = 11 : i64} {
  func.func @ccu_atten_kernel(%arg0: i32, %arg1: memref<32x8x128xf32, #tpu.memory_space<vmem>>, %arg2: memref<128x128xf32, #tpu.memory_space<vmem>>, %arg3: memref<1x128xf32, #tpu.memory_space<vmem>>, %arg4: memref<32x1xf32, #tpu.memory_space<vmem>>) attributes {dimension_semantics = [#tpu.dimension_semantics<parallel>], iteration_bounds = array<i64: 2>, scalar_prefetch = 0 : i64, scratch_operands = 0 : i64, tpu.core_type = #tpu.core_type<tc>, window_params = [{transform_indices = @transform_0, window_bounds = array<i64: 32, 8, 128>}, {pipeline_mode = #tpu.pipeline_mode<synchronous>, transform_indices = @transform_1, window_bounds = array<i64: 128, 128>}, {pipeline_mode = #tpu.pipeline_mode<synchronous>, transform_indices = @transform_2, window_bounds = array<i64: 1, 128>}, {transform_indices = @transform_3, window_bounds = array<i64: 32, 1>}]} {
    %c0 = arith.constant 0 : index
    %c0_0 = arith.constant 0 : index
    %c0_1 = arith.constant 0 : index
    %0 = vector.load %arg1[%c0, %c0_0, %c0_1] : memref<32x8x128xf32, #tpu.memory_space<vmem>>, vector<32x8x128xf32>
    %c0_2 = arith.constant 0 : index
    %c0_3 = arith.constant 0 : index
    %1 = vector.load %arg2[%c0_2, %c0_3] : memref<128x128xf32, #tpu.memory_space<vmem>>, vector<128x128xf32>
    %c0_4 = arith.constant 0 : index
    %c0_5 = arith.constant 0 : index
    %2 = vector.load %arg3[%c0_4, %c0_5] : memref<1x128xf32, #tpu.memory_space<vmem>>, vector<1x128xf32>
    %3 = vector.shape_cast %0 : vector<32x8x128xf32> to vector<256x128xf32>
    %cst = arith.constant dense<0.000000e+00> : vector<256x128xf32>
    %4 = tpu.matmul %3, %1, %cst {dimension_numbers = #tpu.dot_dimension_numbers<[1], [0], [0], [1], [0, 0, 1, 1], [], []>} : vector<256x128xf32>, vector<128x128xf32>, vector<256x128xf32> -> vector<256x128xf32>
    %5 = vector.broadcast %2 : vector<1x128xf32> to vector<256x128xf32>
    %6 = arith.addf %4, %5 : vector<256x128xf32>
    %7 = vector.shape_cast %6 : vector<256x128xf32> to vector<32x8x128xf32>
    %cst_6 = arith.constant dense<0xFF800000> : vector<32x128xf32>
    %8 = vector.multi_reduction <maximumf>, %7, %cst_6 [1] : vector<32x8x128xf32> to vector<32x128xf32>
    %9 = vector.shape_cast %8 : vector<32x128xf32> to vector<32x1x128xf32>
    %10 = vector.broadcast %9 : vector<32x1x128xf32> to vector<32x8x128xf32>
    %11 = arith.subf %7, %10 : vector<32x8x128xf32>
    %12 = math.exp %11 : vector<32x8x128xf32>
    %cst_7 = arith.constant dense<0.000000e+00> : vector<32x128xf32>
    %13 = vector.multi_reduction <add>, %12, %cst_7 [1] : vector<32x8x128xf32> to vector<32x128xf32>
    %14 = vector.shape_cast %13 : vector<32x128xf32> to vector<32x1x128xf32>
    %15 = arith.mulf %12, %0 : vector<32x8x128xf32>
    %cst_8 = arith.constant dense<0.000000e+00> : vector<32x128xf32>
    %16 = vector.multi_reduction <add>, %15, %cst_8 [1] : vector<32x8x128xf32> to vector<32x128xf32>
    %17 = vector.shape_cast %16 : vector<32x128xf32> to vector<32x1x128xf32>
    %18 = tpu.reciprocal %14 {approx = true} : vector<32x1x128xf32> -> vector<32x1x128xf32>
    %19 = arith.mulf %17, %18 : vector<32x1x128xf32>
    %cst_9 = arith.constant dense<0.000000e+00> : vector<32x1xf32>
    %20 = vector.multi_reduction <add>, %19, %cst_9 [2] : vector<32x1x128xf32> to vector<32x1xf32>
    %c0_10 = arith.constant 0 : index
    %c0_11 = arith.constant 0 : index
    %21 = vector.load %arg4[%c0_10, %c0_11] : memref<32x1xf32, #tpu.memory_space<vmem>>, vector<32x1xf32>
    tpu.vector_store %arg4[%c0_10, %c0_11], %20 {strides = array<i32>} : memref<32x1xf32, #tpu.memory_space<vmem>>, vector<32x1xf32>,
    return
  }
  func.func @transform_0(%arg0: i32) -> (i32, i32, i32) {
    %c0_i32 = arith.constant 0 : i32
    %c0_i32_0 = arith.constant 0 : i32
    %c0_i32_1 = arith.constant 0 : i32
    return %arg0, %c0_i32, %c0_i32_0 : i32, i32, i32
  }
  func.func @transform_1(%arg0: i32) -> (i32, i32) {
    %c0_i32 = arith.constant 0 : i32
    %c0_i32_0 = arith.constant 0 : i32
    %c0_i32_1 = arith.constant 0 : i32
    return %c0_i32, %c0_i32_0 : i32, i32
  }
  func.func @transform_2(%arg0: i32) -> (i32, i32) {
    %c0_i32 = arith.constant 0 : i32
    %c0_i32_0 = arith.constant 0 : i32
    %c0_i32_1 = arith.constant 0 : i32
    return %c0_i32, %c0_i32_0 : i32, i32
  }
  func.func @transform_3(%arg0: i32) -> (i32, i32) {
    %c0_i32 = arith.constant 0 : i32
    %c0_i32_0 = arith.constant 0 : i32
    return %arg0, %c0_i32 : i32, i32
  }
}

</mosaic_0001>

<bundles_post_ra>
// kernel: ccu_atten_batched.1
= control target key start
LH: loop header
LB: loop body
LE: loop exit
PB: predicated region body
PF: predicated region fallthrough
CT: control target
= control target key end

     0   :  { %8 = vsyncpa [#allocation3], 0  ;;  %s2684_s0 = inlined_call_operand.hbm [shape: f32[64,8,128], index: 0, kind: input, shape index: {}]   ;;  %s2685_s1 = inlined_call_operand.hbm [shape: f32[128,128], index: 1, kind: input, shape index: {}]   ;;  %s2686_s2 = inlined_call_operand.vmem [shape: f32[1,128], index: 2, kind: input, shape index: {}]   ;;  %s2687_s3 = inlined_call_operand.vmem [shape: f32[64,1], index: 3, kind: output, shape index: {}]  }
   0x1   :  { %10 = vsyncpa [#allocation3 + $0x1], 0 }
   0x2   :  { %11 = vsyncpa [#allocation5], 0  ;;  %s1994_s12 = smov 0   ;;  %s1996_s13 = smov 0  }
   0x3   :  { %s1998_s14 = smov 0   ;;  %s2000_s15 = smov 0  }
   0x4 LB: > { %s1473_s16 = sadd.s32 4294967295, %s1968_s15   ;;  %p37_p0 = scmp.ne.s32.totalorder %s1960_s13, %s1956_s12  ;;  %s1968_s15 = sphi %s2000_s15, %s2703_s15   ;;  %s1964_s14 = sphi %s1998_s14, %s2702_s14   ;;  %s1960_s13 = sphi %s1996_s13, %s2701_s13   ;;  %s1956_s12 = sphi %s1994_s12, %s2700_s12  }
   0x5   : > { %p2016_p1 = scmp.eq.s32.totalorder %s1473_s16, 0  ;;  %p1475_p2 = scmp.ge.s32.totalorder %s1968_s15, 1 }
   0x6   : > { %p116_p3 = scmp.lt.s32.totalorder %s1968_s15, 3  ;;  %s1970_s20 = smov [#allocation4]  }
   0x7   : > { %s2692_s17 = scalar_select %p2016_p1, 1, 0 }
   0x8   : > { %p2024_p4 = por %p2016_p1, %p37_p0  ;;  %p2028_p5 = pnand %p1475_p2, %p116_p3 }
   0x9   : > { %s128_s21 = sshll.u32 %s1970_s20, 4  ;;  %s2041_s23 = sadd.s32 1, %s1968_s15   ;;  %s129_s21 = int_to_ptr.vmem [resolvable:$true] %s128_s21 }
   0xa   : > { %s2693_s18 = scalar_select %p2024_p4, 1, 0 }
   0xb   : > { %s2694_s19 = scalar_select %p2028_p5, 1, 0 }
   0xc   : > { %p1672_p6 = pneg %p2028_p5  ;;  %s24_s24 = sadd.s32 1, %s1964_s14 }
   0xd   : > { %s21_s25 = ssub.s32 %s1968_s15, %s2041_s23  ;;  %s1872_s28 = scalar_lea.hbm %s2685_s1, 2048 }
   0xe   : > { %p2036_p7 = pnand %p1672_p6, %p2016_p1  ;;  %p1873_p8 = scmp.ne.s32.totalorder %s2685_s1, %s1872_s28 }
   0xf   : > { %p1879_p12 = scmp.lt.u32.totalorder %s1872_s28, %s2685_s1 }
  0x10   : > { %p1874_p9 = pneg %p2036_p7 }
  0x12   : > { %p1875_p10 = pnand %p1874_p9, %p1873_p8 }
  0x14   : > { %p1876_p11 = pneg %p1875_p10 }
  0x16   : > { %p1881_p13 = pnand %p1879_p12, %p1876_p11 }
  0x18   : > { %1884 = shalt.err (!%p1881_p13)
}
  0x19   : > { %s1885_s6 = scalar_lea.vmem %s129_s21, 2048  ;;  %p1893_p6 = scmp.lt.s32.totalorder %s129_s21, %s129_s21 }
  0x1a   : > { %p1886_p0 = scmp.ne.s32.totalorder %s129_s21, %s1885_s6  ;;  %p1894_p1 = scmp.lt.s32.totalorder %s1885_s6, %s1885_s6 }
  0x1c   : > { %p1888_p2 = pnand %p1886_p0, %p1874_p9  ;;  %p1895_p4 = por %p1894_p1, %p1893_p6 }
  0x1e   : > { %p1889_p3 = pneg %p1888_p2 }
  0x20   : > { %p1896_p5 = pnand %p1895_p4, %p1889_p3 }
  0x22   : > { %1899 = shalt.err (!%p1896_p5)
}
  0x23   : > { %s1971_s7 = smov 128   ;;  %s1972_s8 = smov 8  }
  0x24   : > { %1675 = dma.hbm_to_vmem [thread:$0]  (!%p2036_p7), %s2685_s1, 2048, %s129_s21, [#allocation5], %s1971_s7, %s1971_s7, %s1972_s8  }
  0x25   : > { %p22_p1 = scmp.eq.s32.totalorder %s21_s25, 0  ;;  %p31_p4 = scmp.ne.s32.totalorder %s1964_s14, %s1960_s13 }
  0x26   : > { %p32_p5 = scmp.eq.s32.totalorder %s1968_s15, 0  ;;  %p1681_p8 = scmp.lt.s32.totalorder %s1968_s15, 2 }
  0x27   : > { %s2070_s11 = scalar_select %p22_p1, %s1964_s14, %s24_s24  }
  0x28   : > { %p33_p9 = por %p32_p5, %p31_p4  ;;  %s145_s12 = sand.u32 1, %s1964_s14  }
  0x29   : > { %s1478_s20 = sshll.u32 %s145_s12, 8  ;;  %s1489_s26 = sshll.u32 %s1968_s15, 12 }
  0x2a   : > { %s2077_s22 = scalar_lea.hbm %s2684_s0, %s1489_s26  ;;  %s149_s21 = scalar_lea.vmem [#allocation2], %s1478_s20 }
  0x2b   : > { %s156_s25 = sshll.u32 %s149_s21, 4  ;;  %p2081_p7 = pnand %p1681_p8, %p33_p9  ;;  %s2079_s25 = int_to_ptr.vmem [resolvable:$true] %s156_s25 }
  0x2c   : > { %s2085_s29 = scalar_lea.sflag [#allocation3], %s145_s12  ;;  %s1900_s30 = scalar_lea.hbm %s2077_s22, 4096 }
  0x2d   : > { %p1901_p10 = scmp.ne.s32.totalorder %s2077_s22, %s1900_s30  ;;  %p1902_p11 = pneg %p2081_p7 }
  0x2e   : > { %s1905_s6 = scalar_lea.hbm %s2684_s0, 8192  ;;  %p1906_p0 = scmp.lt.u32.totalorder %s2077_s22, %s2684_s0 }
  0x2f   : > { %p1903_p12 = pnand %p1902_p11, %p1901_p10  ;;  %p1907_p2 = scmp.lt.u32.totalorder %s1905_s6, %s1900_s30 }
  0x30   : > { %p1909_p6 = scmp.lt.u32.totalorder %s1900_s30, %s2077_s22 }
  0x31   : > { %p1904_p13 = pneg %p1903_p12  ;;  %p1908_p3 = por %p1907_p2, %p1906_p0 }
  0x33   : > { %p1910_p1 = por %p1909_p6, %p1908_p3 }
  0x35   : > { %p1911_p4 = pnand %p1910_p1, %p1904_p13 }
  0x37   : > { %1914 = shalt.err (!%p1911_p4)
}
  0x38   : > { %s1915_s12 = scalar_lea.vmem %s2079_s25, 4096  ;;  %s1973_s20 = smov [#allocation2]  }
  0x39   : > { %p1916_p5 = scmp.ne.s32.totalorder %s2079_s25, %s1915_s12  ;;  %s1920_s26 = sshll.u32 %s1973_s20, 4  ;;  %s1921_s26 = int_to_ptr.vmem [resolvable:$false] %s1920_s26 }
  0x3a   : > { %s1922_s27 = scalar_lea.vmem %s1921_s26, 8192  ;;  %p1923_p10 = scmp.lt.s32.totalorder %s2079_s25, %s1921_s26 }
  0x3b   : > { %p1918_p8 = pnand %p1916_p5, %p1902_p11  ;;  %p1924_p12 = scmp.lt.s32.totalorder %s1922_s27, %s1915_s12 }
  0x3d   : > { %p1919_p9 = pneg %p1918_p8  ;;  %p1925_p0 = por %p1924_p12, %p1923_p10 }
  0x3f   : > { %p1926_p2 = pnand %p1925_p0, %p1919_p9 }
  0x41   : > { %1929 = shalt.err (!%p1926_p2)
}
  0x42   : > { %1679 = dma.hbm_to_vmem [thread:$0]  (!%p2081_p7), %s2077_s22, 4096, %s2079_s25, %s2085_s29, %s1971_s7, %s1971_s7, %s1972_s8  }
  0x43   : > { %p2697_p11 = scmp.ne.s32.totalorder %s2694_s19, 0 }
  0x44   : > { %s170_s28 = sand.u32 (!%p2697_p11), 1, %s1960_s13   ;;  %p2698_p13 = scmp.ne.s32.totalorder (!%p2697_p11), %s2693_s18, 0 }
  0x45   : > { %168 = sbr.rel (%p2697_p11) target bundleno = 687 (0x2af), region = 32  ;;  %s1482_s21 = sshll.u32 (!%p2697_p11), %s170_s28, 8 }
  0x46   : > { %s171_s30 = scalar_lea.sflag (!%p2697_p11), [#allocation3], %s170_s28  ;;  %s2119_s4 = scalar_lea.vmem (!%p2697_p11), [#allocation2], %s1482_s21 }
  0x4c   : > { %1947 = dma.done.wait (%p2698_p13), %s171_s30, 4096  }
  0x4d   : > { %1949 = vsyncadd (%p2698_p13), %s171_s30, 4294963200  ;;  %p2699_p3 = scmp.ne.s32.totalorder %s2692_s17, 0 }
  0x4f   : > { %1951 = dma.done.wait (%p2699_p3), [#allocation5], 2048  }
  0x50   : > { %1953 = vsyncadd (%p2699_p3), [#allocation5], 4294965248  ;;  %v240_v0 = vld [vmem:[#allocation4] sm:$0xff]  ;;  %v241_v1 = vld [vmem:[#allocation4 + $0x8] sm:$0xff]  ;;  %vm1352_vm0 = vcmask 1041409   ;;  %vm1354_vm1 = vcmask 1042434  }
  0x51   : > { %v242_v2 = vld [vmem:[#allocation4 + $0x10] sm:$0xff]  ;;  %v1618_v3 = vpack.c.bf16 %v241_v1, %v240_v0  ;;  %v243_v4 = vld [vmem:[#allocation4 + $0x18] sm:$0xff]  ;;  %v244_v6 = vld [vmem:[#allocation4 + $0x20] sm:$0xff]  ;;  %vm1356_vm2 = vcmask 1043459   ;;  %s1484_s19 = sshll.u32 %s1473_s16, 2  ;;  %vm1358_vm3 = vcmask 1044484  }
  0x52   : > { %v1622_v5 = vpack.c.bf16 %v243_v4, %v242_v2  ;;  %v245_v7 = vld [vmem:[#allocation4 + $0x28] sm:$0xff]  ;;  %v208_v9 = vld [vmem:[%s2119_s4] sm:$0xff]  ;;  %v246_v11 = vld [vmem:[#allocation4 + $0x30] sm:$0xff]  ;;  %p203_p7 = scmp.lt.s32.totalorder %s1484_s19, 7  ;;  %vm1360_vm4 = vcmask 1045509   ;;  %vm1362_vm5 = vcmask 1046534  }
  0x53   : > { %1619 = vmatprep.subr.bf16.mxu0 %v1618_v3  ;;  %1650 = vmatprep.subr.bf16.mxu1 %v1618_v3  ;;  %v1626_v8 = vpack.c.bf16 %v245_v7, %v244_v6  ;;  %v2131_v10 = vld [vmem:[%s2119_s4 + $0x80] sm:$0xff]  ;;  %v247_v12 = vld [vmem:[#allocation4 + $0x38] sm:$0xff]  ;;  %v249_v15 = vld [vmem:[#allocation4 + $0x48] sm:$0xff]  ;;  %vm1391_vm6 = vcmask 7168   ;;  %vm1364_vm7 = vcmask 1047559  }
  0x54   : > { %1621 = vmatpush3.bf16.msra.mxu0 %v1618_v3  ;;  %1658 = vmatpush3.bf16.msra.mxu1 %v1618_v3  ;;  %v1630_v13 = vpack.c.bf16 %v247_v12, %v246_v11  ;;  %v248_v14 = vld [vmem:[#allocation4 + $0x40] sm:$0xff]  ;;  %v250_v17 = vld [vmem:[#allocation4 + $0x50] sm:$0xff]  ;;  %v251_v18 = vld [vmem:[#allocation4 + $0x58] sm:$0xff]  ;;  %s2705_s19 = smov (!%p203_p7, %s1484_s19), 7 }
  0x55   : > { %1623 = vmatprep.subr.bf16.mxu0 %v1622_v5  ;;  %1651 = vmatprep.subr.bf16.mxu1 %v1622_v5  ;;  %v1634_v16 = vpack.c.bf16 %v249_v15, %v248_v14  ;;  %v1638_v19 = vpack.c.bf16 %v251_v18, %v250_v17  ;;  %v252_v20 = vld [vmem:[#allocation4 + $0x60] sm:$0xff]  ;;  %v253_v21 = vld [vmem:[#allocation4 + $0x68] sm:$0xff]  ;;  %v254_v23 = vld [vmem:[#allocation4 + $0x70] sm:$0xff]  ;;  %s1485_s7 = sshll.u32 %s2705_s19, 3 }
  0x56   : > { %1570 = vmatprep.mubr.f32.mxu0 %v208_v9  ;;  %1594 = vmatprep.mubr.f32.mxu1 %v2131_v10  ;;  %v1642_v22 = vpack.c.bf16 %v253_v21, %v252_v20  ;;  %v255_v24 = vld [vmem:[#allocation4 + $0x78] sm:$0xff]  ;;  %v2135_v26 = vld [vmem:[%s2119_s4 + $0x8] sm:$0xff]  ;;  %v2141_v28 = vld [vmem:[%s2119_s4 + $0x10] sm:$0xff]  ;;  %s2640_s8 = scalar_lea.vmem %s2687_s3, %s1485_s7 }
  0x57   : > { %v1646_v25 = vpack.c.bf16 %v255_v24, %v254_v23  ;;  %v2138_v27 = vld [vmem:[%s2119_s4 + $0x88] sm:$0xff]  ;;  %v226_v29 = vld [vmem:[%s2119_s4 + $0x90] sm:$0xff]  ;;  %v2148_v30 = vld [vmem:[%s2119_s4 + $0x18] sm:$0xff] }
  0x58   : > { %1625 = vmatpush3.bf16.msra.mxu0 %v1622_v5  ;;  %1659 = vmatpush3.bf16.msra.mxu1 %v1622_v5  ;;  %v2151_v31 = vld [vmem:[%s2119_s4 + $0x98] sm:$0xff]  ;;  %v212_v32 = vld [vmem:[%s2119_s4 + $0x20] sm:$0xff]  ;;  %v213_v34 = vld [vmem:[%s2119_s4 + $0x28] sm:$0xff] }
  0x59   : > { %1627 = vmatprep.subr.bf16.mxu0 %v1626_v8  ;;  %1652 = vmatprep.subr.bf16.mxu1 %v1626_v8  ;;  %v228_v33 = vld [vmem:[%s2119_s4 + $0xa0] sm:$0xff]  ;;  %v229_v35 = vld [vmem:[%s2119_s4 + $0xa8] sm:$0xff]  ;;  %v214_v36 = vld [vmem:[%s2119_s4 + $0x30] sm:$0xff] }
  0x5a   : > { %v230_v37 = vld [vmem:[%s2119_s4 + $0xb0] sm:$0xff]  ;;  %v215_v38 = vld [vmem:[%s2119_s4 + $0x38] sm:$0xff]  ;;  %v216_v40 = vld [vmem:[%s2119_s4 + $0x40] sm:$0xff] }
  0x5b   : > { %v231_v39 = vld [vmem:[%s2119_s4 + $0xb8] sm:$0xff]  ;;  %v232_v41 = vld [vmem:[%s2119_s4 + $0xc0] sm:$0xff]  ;;  %v217_v42 = vld [vmem:[%s2119_s4 + $0x48] sm:$0xff] }
  0x5c   : > { %1629 = vmatpush3.bf16.msra.mxu0 %v1626_v8  ;;  %1660 = vmatpush3.bf16.msra.mxu1 %v1626_v8  ;;  %v233_v43 = vld [vmem:[%s2119_s4 + $0xc8] sm:$0xff]  ;;  %v218_v44 = vld [vmem:[%s2119_s4 + $0x50] sm:$0xff]  ;;  %v219_v46 = vld [vmem:[%s2119_s4 + $0x58] sm:$0xff] }
  0x5d   : > { %1631 = vmatprep.subr.bf16.mxu0 %v1630_v13  ;;  %1653 = vmatprep.subr.bf16.mxu1 %v1630_v13  ;;  %v234_v45 = vld [vmem:[%s2119_s4 + $0xd0] sm:$0xff]  ;;  %v235_v47 = vld [vmem:[%s2119_s4 + $0xd8] sm:$0xff]  ;;  %v220_v48 = vld [vmem:[%s2119_s4 + $0x60] sm:$0xff] }
  0x5e   : > { %v236_v49 = vld [vmem:[%s2119_s4 + $0xe0] sm:$0xff]  ;;  %v221_v50 = vld [vmem:[%s2119_s4 + $0x68] sm:$0xff]  ;;  %v222_v52 = vld [vmem:[%s2119_s4 + $0x70] sm:$0xff] }
  0x5f   : > { %v237_v51 = vld [vmem:[%s2119_s4 + $0xe8] sm:$0xff]  ;;  %v238_v53 = vld [vmem:[%s2119_s4 + $0xf0] sm:$0xff]  ;;  %v223_v54 = vld [vmem:[%s2119_s4 + $0x78] sm:$0xff] }
  0x60   : > { %1633 = vmatpush3.bf16.msra.mxu0 %v1630_v13  ;;  %1661 = vmatpush3.bf16.msra.mxu1 %v1630_v13  ;;  %v239_v55 = vld [vmem:[%s2119_s4 + $0xf8] sm:$0xff]  ;;  %v2182_v56 = vld [vmem:[%s2686_s2] ss:$0 sm:$0xff] }
  0x61   : > { %1635 = vmatprep.subr.bf16.mxu0 %v1634_v16  ;;  %1654 = vmatprep.subr.bf16.mxu1 %v1634_v16 }
  0x64   : > { %1637 = vmatpush3.bf16.msra.mxu0 %v1634_v16  ;;  %1662 = vmatpush3.bf16.msra.mxu1 %v1634_v16 }
  0x65   : > { %1639 = vmatprep.subr.bf16.mxu0 %v1638_v19  ;;  %1655 = vmatprep.subr.bf16.mxu1 %v1638_v19 }
  0x68   : > { %1641 = vmatpush3.bf16.msra.mxu0 %v1638_v19  ;;  %1663 = vmatpush3.bf16.msra.mxu1 %v1638_v19 }
  0x69   : > { %1643 = vmatprep.subr.bf16.mxu0 %v1642_v22  ;;  %1656 = vmatprep.subr.bf16.mxu1 %v1642_v22 }
  0x6c   : > { %1645 = vmatpush3.bf16.msra.mxu0 %v1642_v22  ;;  %1664 = vmatpush3.bf16.msra.mxu1 %v1642_v22 }
  0x6d   : > { %1647 = vmatprep.subr.bf16.mxu0 %v1646_v25  ;;  %1657 = vmatprep.subr.bf16.mxu1 %v1646_v25 }
  0x70   : > { %1649 = vmatpush3.bf16.msra.mxu0 %v1646_v25  ;;  %1665 = vmatpush3.bf16.msra.mxu1 %v1646_v25 }
  0x73   : > { %1571 = vmatmul.mubr.f32.vlgmr.msra.gmra.mrb[0].mxu0 %v2135_v26  ;;  %1595 = vmatmul.mubr.f32.vlgmr.msra.gmra.mrb[0].mxu1 %v2138_v27 }
  0x74   : > { %1573 = vmatprep.mubr.f32.mxu0 %v2141_v28  ;;  %1597 = vmatprep.mubr.f32.mxu1 %v226_v29 }
  0x77   : > { %1574 = vmatmul.mubr.f32.gmra.mrb[2].mxu0 %v2148_v30  ;;  %1598 = vmatmul.mubr.f32.gmra.mrb[2].mxu1 %v2151_v31 }
  0x78   : > { %1576 = vmatprep.mubr.f32.mxu0 %v212_v32  ;;  %1600 = vmatprep.mubr.f32.mxu1 %v228_v33 }
  0x7b   : > { %1577 = vmatmul.mubr.f32.gmra.mrb[4].mxu0 %v213_v34  ;;  %1601 = vmatmul.mubr.f32.gmra.mrb[4].mxu1 %v229_v35 }
  0x7c   : > { %1579 = vmatprep.mubr.f32.mxu0 %v214_v36  ;;  %1603 = vmatprep.mubr.f32.mxu1 %v230_v37 }
  0x7f   : > { %1580 = vmatmul.mubr.f32.gmra.mrb[6].mxu0 %v215_v38  ;;  %1604 = vmatmul.mubr.f32.gmra.mrb[6].mxu1 %v231_v39 }
  0x80   : > { %1582 = vmatprep.mubr.f32.mxu0 %v216_v40  ;;  %1606 = vmatprep.mubr.f32.mxu1 %v232_v41 }
  0x83   : > { %1583 = vmatmul.mubr.f32.gmra.mrb[8].mxu0 %v217_v42  ;;  %1607 = vmatmul.mubr.f32.gmra.mrb[8].mxu1 %v233_v43 }
  0x84   : > { %1585 = vmatprep.mubr.f32.mxu0 %v218_v44  ;;  %1609 = vmatprep.mubr.f32.mxu1 %v234_v45 }
  0x87   : > { %1586 = vmatmul.mubr.f32.gmra.mrb[10].mxu0 %v219_v46  ;;  %1610 = vmatmul.mubr.f32.gmra.mrb[10].mxu1 %v235_v47 }
  0x88   : > { %1588 = vmatprep.mubr.f32.mxu0 %v220_v48  ;;  %1612 = vmatprep.mubr.f32.mxu1 %v236_v49 }
  0x8b   : > { %1589 = vmatmul.mubr.f32.gmra.mrb[12].mxu0 %v221_v50  ;;  %1613 = vmatmul.mubr.f32.gmra.mrb[12].mxu1 %v237_v51 }
  0x8c   : > { %1591 = vmatprep.mubr.f32.mxu0 %v222_v52  ;;  %1615 = vmatprep.mubr.f32.mxu1 %v238_v53 }
  0x8f   : > { %1592 = vmatmul.mubr.f32.gmra.mrb[14].mxu0 %v223_v54  ;;  %1616 = vmatmul.mubr.f32.gmra.mrb[14].mxu1 %v239_v55 }
 0x146   : > { %v1572_v57 = vpop.f32.mrb[0].mxu0  ;;  %v1596_v58 = vpop.f32.mrb[0].mxu1 }
 0x147   : > { %v2185_v59 = vadd.f32 %v1572_v57, %v2182_v56  ;;  %v2188_v60 = vadd.f32 %v1596_v58, %v2182_v56  ;;  %v329_v61 = vpop.f32.mrb[1].mxu0  ;;  %v409_v62 = vpop.f32.mrb[1].mxu1 }
 0x148   : > { %v2191_v63 = vadd.f32 %v2182_v56, %v329_v61  ;;  %v2194_v0 = vadd.f32 %v2182_v56, %v409_v62 }
 0x149   : > { %v494_v1 = vrot.slane %v2185_v59, 4  ;;  %v590_v2 = vrot.slane %v2188_v60, 4 }
 0x14a   : > { %v488_v3 = vrot.slane %v2191_v63, 4  ;;  %v584_v4 = vrot.slane %v2194_v0, 4  ;;  %v1575_v5 = vpop.f32.mrb[2].mxu0  ;;  %v1599_v6 = vpop.f32.mrb[2].mxu1 }
 0x14b   : > { %v495_v7 = vmax.f32 %v2185_v59, %v494_v1  ;;  %v591_v8 = vmax.f32 %v2188_v60, %v590_v2  ;;  %v2203_v9 = vadd.f32 %v1575_v5, %v2182_v56  ;;  %v2206_v11 = vadd.f32 %v1599_v6, %v2182_v56  ;;  %v339_v12 = vpop.f32.mrb[3].mxu0  ;;  %v419_v13 = vpop.f32.mrb[3].mxu1 }
 0x14c   : > { %v489_v14 = vmax.f32 %v2191_v63, %v488_v3  ;;  %v585_v15 = vmax.f32 %v2194_v0, %v584_v4  ;;  %v2211_v16 = vadd.f32 %v2182_v56, %v339_v12  ;;  %v2214_v17 = vadd.f32 %v2182_v56, %v419_v13 }
 0x14d   : > { %v496_v18 = vrot.slane %v495_v7, 2  ;;  %v592_v19 = vrot.slane %v591_v8, 2  ;;  %v506_v20 = vrot.slane %v2203_v9, 4  ;;  %v602_v21 = vrot.slane %v2206_v11, 4 }
 0x14e   : > { %v490_v22 = vrot.slane %v489_v14, 2  ;;  %v586_v23 = vrot.slane %v585_v15, 2  ;;  %v500_v24 = vrot.slane %v2211_v16, 4  ;;  %v596_v25 = vrot.slane %v2214_v17, 4  ;;  %v1578_v29 = vpop.f32.mrb[4].mxu0  ;;  %v1602_v32 = vpop.f32.mrb[4].mxu1 }
 0x14f   : > { %v497_v33 = vmax.f32 %v495_v7, %v496_v18  ;;  %v593_v34 = vmax.f32 %v591_v8, %v592_v19  ;;  %v507_v35 = vmax.f32 %v2203_v9, %v506_v20  ;;  %v603_v36 = vmax.f32 %v2206_v11, %v602_v21  ;;  %v2222_v37 = vpop.f32.mrb[5].mxu0  ;;  %v2224_v38 = vpop.f32.mrb[5].mxu1 }
 0x150   : > { %v491_v39 = vmax.f32 %v489_v14, %v490_v22  ;;  %v587_v40 = vmax.f32 %v585_v15, %v586_v23  ;;  %v501_v41 = vmax.f32 %v2211_v16, %v500_v24  ;;  %v597_v42 = vmax.f32 %v2214_v17, %v596_v25 }
 0x151   : > { %v498_v43 = vrot.slane %v497_v33, 1  ;;  %v594_v44 = vrot.slane %v593_v34, 1  ;;  %v508_v45 = vrot.slane %v507_v35, 2  ;;  %v604_v46 = vrot.slane %v603_v36, 2 }
 0x152   : > { %v492_v47 = vrot.slane %v491_v39, 1  ;;  %v588_v48 = vrot.slane %v587_v40, 1  ;;  %v502_v49 = vrot.slane %v501_v41, 2  ;;  %v598_v50 = vrot.slane %v597_v42, 2  ;;  %v1581_v51 = vpop.f32.mrb[6].mxu0  ;;  %v1605_v52 = vpop.f32.mrb[6].mxu1 }
 0x153   : > { %v499_v53 = vmax.f32 %v497_v33, %v498_v43  ;;  %v595_v54 = vmax.f32 %v593_v34, %v594_v44  ;;  %v509_v55 = vmax.f32 %v507_v35, %v508_v45  ;;  %v605_v57 = vmax.f32 %v603_v36, %v604_v46  ;;  %v2228_v58 = vpop.f32.mrb[7].mxu0  ;;  %v2230_v61 = vpop.f32.mrb[7].mxu1 }
 0x154   : > { %v493_v62 = vmax.f32 %v491_v39, %v492_v47  ;;  %v589_v1 = vmax.f32 %v587_v40, %v588_v48  ;;  %v503_v2 = vmax.f32 %v501_v41, %v502_v49  ;;  %v599_v3 = vmax.f32 %v597_v42, %v598_v50 }
 0x155   : > { %v681_v4 = vsub.f32 %v2185_v59, %v499_v53  ;;  %v697_v5 = vsub.f32 %v2188_v60, %v595_v54  ;;  %v510_v6 = vrot.slane %v509_v55, 1  ;;  %v606_v7 = vrot.slane %v605_v57, 1 }
 0x156   : > { %v680_v8 = vsub.f32 %v2191_v63, %v493_v62  ;;  %v696_v12 = vsub.f32 %v2194_v0, %v589_v1  ;;  %v504_v13 = vrot.slane %v503_v2, 1  ;;  %v600_v14 = vrot.slane %v599_v3, 1  ;;  %v2236_v15 = vpop.f32.mrb[8].mxu0  ;;  %v2238_v18 = vpop.f32.mrb[8].mxu1 }
 0x157   : > { %v714_v19 = vmul.f32 1.442695, %v681_v4  ;;  %v746_v20 = vmul.f32 1.442695, %v697_v5  ;;  %v511_v21 = vmax.f32 %v509_v55, %v510_v6  ;;  %v607_v22 = vmax.f32 %v605_v57, %v606_v7  ;;  %v2240_v23 = vpop.f32.mrb[9].mxu0  ;;  %v2242_v59 = vpop.f32.mrb[9].mxu1 }
 0x158   : > { %v712_v60 = vmul.f32 1.442695, %v680_v8  ;;  %v744_v24 = vmul.f32 1.442695, %v696_v12  ;;  %v505_v25 = vmax.f32 %v503_v2, %v504_v13  ;;  %v601_v63 = vmax.f32 %v599_v3, %v600_v14 }
 0x159   : > { %1718 = vpow2.f32 %v714_v19  ;;  %v683_v0 = vsub.f32 %v2203_v9, %v511_v21  ;;  %v699_v33 = vsub.f32 %v2206_v11, %v607_v22  ;;  %v2247_v34 = vadd.f32 %v1578_v29, %v2182_v56 }
 0x15a   : > { %1720 = vpow2.f32 %v746_v20  ;;  %v682_v35 = vsub.f32 %v2211_v16, %v505_v25  ;;  %v698_v36 = vsub.f32 %v2214_v17, %v601_v63  ;;  %v2252_v39 = vadd.f32 %v1602_v32, %v2182_v56  ;;  %v2254_v40 = vpop.f32.mrb[10].mxu0  ;;  %v2256_v41 = vpop.f32.mrb[10].mxu1 }
 0x15b   : > { %1722 = vpow2.f32 %v712_v60  ;;  %v718_v42 = vmul.f32 1.442695, %v683_v0  ;;  %v750_v9 = vmul.f32 1.442695, %v699_v33  ;;  %v518_v11 = vrot.slane %v2247_v34, 4  ;;  %v2259_v43 = vpop.f32.mrb[11].mxu0 }
 0x15c   : > { %1724 = vpow2.f32 %v744_v24  ;;  %v716_v29 = vmul.f32 1.442695, %v682_v35  ;;  %v748_v44 = vmul.f32 1.442695, %v698_v36  ;;  %v614_v16 = vrot.slane %v2252_v39, 4  ;;  %v2262_v17 = vpop.f32.mrb[11].mxu1 }
 0x15d   : > { %1726 = vpow2.f32 %v718_v42  ;;  %v519_v32 = vmax.f32 %v2247_v34, %v518_v11  ;;  %v2267_v45 = vadd.f32 %v2182_v56, %v2222_v37  ;;  %v2271_v46 = vadd.f32 %v2182_v56, %v2224_v38 }
 0x15e   : > { %1728 = vpow2.f32 %v750_v9  ;;  %v615_v47 = vmax.f32 %v2252_v39, %v614_v16  ;;  %v2275_v48 = vadd.f32 %v1581_v51, %v2182_v56  ;;  %v2278_v49 = vadd.f32 %v1605_v52, %v2182_v56  ;;  %v2280_v50 = vpop.f32.mrb[12].mxu0  ;;  %v2282_v53 = vpop.f32.mrb[12].mxu1 }
 0x15f   : > { %1730 = vpow2.f32 %v716_v29  ;;  %v520_v37 = vrot.slane %v519_v32, 2  ;;  %v512_v54 = vrot.slane %v2267_v45, 4  ;;  %v608_v38 = vrot.slane %v2271_v46, 4  ;;  %v2286_v55 = vpop.f32.mrb[13].mxu0  ;;  %v2288_v57 = vpop.f32.mrb[13].mxu1 }
 0x160   : > { %1732 = vpow2.f32 %v748_v44  ;;  %v616_v51 = vrot.slane %v615_v47, 2  ;;  %v530_v62 = vrot.slane %v2275_v48, 4  ;;  %v626_v52 = vrot.slane %v2278_v49, 4 }
 0x161   : > { %v521_v1 = vmax.f32 %v519_v32, %v520_v37  ;;  %v513_v2 = vmax.f32 %v2267_v45, %v512_v54  ;;  %v609_v3 = vmax.f32 %v2271_v46, %v608_v38  ;;  %v2296_v4 = vadd.f32 %v2182_v56, %v2228_v58 }
 0x162   : > { %v617_v5 = vmax.f32 %v615_v47, %v616_v51  ;;  %v531_v6 = vmax.f32 %v2275_v48, %v530_v62  ;;  %v627_v7 = vmax.f32 %v2278_v49, %v626_v52  ;;  %v2302_v8 = vadd.f32 %v2182_v56, %v2230_v61  ;;  %v2304_v12 = vpop.f32.mrb[14].mxu0  ;;  %v2306_v13 = vpop.f32.mrb[14].mxu1 }
 0x163   : > { %v2308_v14 = vpop.eup %1718  ;;  %v522_v19 = vrot.slane %v521_v1, 1  ;;  %v514_v20 = vrot.slane %v513_v2, 2  ;;  %v610_v21 = vrot.slane %v609_v3, 2  ;;  %v524_v58 = vrot.slane %v2296_v4, 4  ;;  %v2311_v22 = vpop.f32.mrb[15].mxu0 }
 0x164   : > { %v2313_v60 = vpop.f32.mrb[15].mxu1  ;;  %v2315_v24 = vpop.eup %1720  ;;  %v618_v25 = vrot.slane %v617_v5, 1  ;;  %v532_v61 = vrot.slane %v531_v6, 2  ;;  %v628_v63 = vrot.slane %v627_v7, 2  ;;  %v620_v0 = vrot.slane %v2302_v8, 4 }
 0x165   : > { %v2318_v33 = vpop.eup %1722  ;;  %v523_v35 = vmax.f32 %v521_v1, %v522_v19  ;;  %v515_v36 = vmax.f32 %v513_v2, %v514_v20  ;;  %v611_v42 = vmax.f32 %v609_v3, %v610_v21  ;;  %v525_v9 = vmax.f32 %v2296_v4, %v524_v58 }
 0x166   : > { %v2321_v11 = vpop.eup %1724  ;;  %v619_v29 = vmax.f32 %v617_v5, %v618_v25  ;;  %v533_v44 = vmax.f32 %v531_v6, %v532_v61  ;;  %v629_v16 = vmax.f32 %v627_v7, %v628_v63  ;;  %v621_v32 = vmax.f32 %v2302_v8, %v620_v0 }
 0x167   : > { %v2324_v47 = vpop.eup %1726  ;;  %v685_v37 = vsub.f32 %v2247_v34, %v523_v35  ;;  %v516_v54 = vrot.slane %v515_v36, 1  ;;  %v612_v38 = vrot.slane %v611_v42, 1  ;;  %v526_v51 = vrot.slane %v525_v9, 2 }
 0x168   : > { %v2327_v62 = vpop.eup %1728  ;;  %v701_v52 = vsub.f32 %v2252_v39, %v619_v29  ;;  %v534_v1 = vrot.slane %v533_v44, 1  ;;  %v630_v2 = vrot.slane %v629_v16, 1  ;;  %v622_v3 = vrot.slane %v621_v32, 2 }
 0x169   : > { %v2330_v19 = vpop.eup %1730  ;;  %v722_v5 = vmul.f32 1.442695, %v685_v37  ;;  %v517_v6 = vmax.f32 %v515_v36, %v516_v54  ;;  %v613_v7 = vmax.f32 %v611_v42, %v612_v38  ;;  %v527_v20 = vmax.f32 %v525_v9, %v526_v51 }
 0x16a   : > { %v2332_v21 = vpop.eup %1732  ;;  %v754_v58 = vmul.f32 1.442695, %v701_v52  ;;  %v535_v34 = vmax.f32 %v533_v44, %v534_v1  ;;  %v631_v25 = vmax.f32 %v629_v16, %v630_v2  ;;  %v623_v61 = vmax.f32 %v621_v32, %v622_v3 }
 0x16b   : > { %1734 = vpow2.f32 %v722_v5  ;;  %v684_v63 = vsub.f32 %v2267_v45, %v517_v6  ;;  %v700_v39 = vsub.f32 %v2271_v46, %v613_v7  ;;  %v528_v0 = vrot.slane %v527_v20, 1 }
 0x16c   : > { %1736 = vpow2.f32 %v754_v58  ;;  %v687_v35 = vsub.f32 %v2275_v48, %v535_v34  ;;  %v703_v29 = vsub.f32 %v2278_v49, %v631_v25  ;;  %v624_v36 = vrot.slane %v623_v61, 1 }
 0x16d   : > { %v720_v42 = vmul.f32 1.442695, %v684_v63  ;;  %v752_v9 = vmul.f32 1.442695, %v700_v39  ;;  %v529_v37 = vmax.f32 %v527_v20, %v528_v0  ;;  %v2340_v44 = vadd.f32 %v2236_v15, %v2182_v56 }
 0x16e   : > { %v726_v16 = vmul.f32 1.442695, %v687_v35  ;;  %v758_v32 = vmul.f32 1.442695, %v703_v29  ;;  %v625_v54 = vmax.f32 %v623_v61, %v624_v36  ;;  %v2344_v45 = vadd.f32 %v2238_v18, %v2182_v56 }
 0x16f   : > { %1738 = vpow2.f32 %v720_v42  ;;  %v686_v46 = vsub.f32 %v2296_v4, %v529_v37  ;;  %v542_v48 = vrot.slane %v2340_v44, 4  ;;  %v2350_v49 = vadd.f32 %v2182_v56, %v2240_v23 }
 0x170   : > { %1740 = vpow2.f32 %v752_v9  ;;  %v702_v15 = vsub.f32 %v2302_v8, %v625_v54  ;;  %v638_v38 = vrot.slane %v2344_v45, 4  ;;  %v2356_v51 = vadd.f32 %v2182_v56, %v2242_v59 }
 0x171   : > { %1742 = vpow2.f32 %v726_v16  ;;  %v724_v18 = vmul.f32 1.442695, %v686_v46  ;;  %v543_v52 = vmax.f32 %v2340_v44, %v542_v48  ;;  %v536_v4 = vrot.slane %v2350_v49, 4 }
 0x172   : > { %1744 = vpow2.f32 %v758_v32  ;;  %v756_v1 = vmul.f32 1.442695, %v702_v15  ;;  %v639_v23 = vmax.f32 %v2344_v45, %v638_v38  ;;  %v632_v2 = vrot.slane %v2356_v51, 4 }
 0x173   : > { %1746 = vpow2.f32 %v724_v18  ;;  %v544_v8 = vrot.slane %v543_v52, 2  ;;  %v537_v3 = vmax.f32 %v2350_v49, %v536_v4  ;;  %v2365_v59 = vadd.f32 %v2254_v40, %v2182_v56 }
 0x174   : > { %1748 = vpow2.f32 %v756_v1  ;;  %v640_v5 = vrot.slane %v639_v23, 2  ;;  %v633_v6 = vmax.f32 %v2356_v51, %v632_v2  ;;  %v2370_v7 = vadd.f32 %v2256_v41, %v2182_v56 }
 0x175   : > { %v2372_v20 = vpop.eup %1734  ;;  %v545_v58 = vmax.f32 %v543_v52, %v544_v8  ;;  %v538_v34 = vrot.slane %v537_v3, 2  ;;  %v554_v25 = vrot.slane %v2365_v59, 4  ;;  %v2377_v61 = vadd.f32 %v2182_v56, %v2259_v43 }
 0x176   : > { %v2379_v40 = vpop.eup %1736  ;;  %v641_v63 = vmax.f32 %v639_v23, %v640_v5  ;;  %v634_v39 = vrot.slane %v633_v6, 2  ;;  %v650_v0 = vrot.slane %v2370_v7, 4  ;;  %v2384_v41 = vadd.f32 %v2182_v56, %v2262_v17 }
 0x177   : > { %v546_v35 = vrot.slane %v545_v58, 1  ;;  %v539_v29 = vmax.f32 %v537_v3, %v538_v34  ;;  %v555_v36 = vmax.f32 %v2365_v59, %v554_v25  ;;  %v548_v42 = vrot.slane %v2377_v61, 4 }
 0x178   : > { %v642_v9 = vrot.slane %v641_v63, 1  ;;  %v635_v37 = vmax.f32 %v633_v6, %v634_v39  ;;  %v651_v43 = vmax.f32 %v2370_v7, %v650_v0  ;;  %v644_v16 = vrot.slane %v2384_v41, 4 }
 0x179   : > { %v2390_v32 = vpop.eup %1738  ;;  %v547_v54 = vmax.f32 %v545_v58, %v546_v35  ;;  %v540_v46 = vrot.slane %v539_v29, 1  ;;  %v556_v48 = vrot.slane %v555_v36, 2  ;;  %v549_v17 = vmax.f32 %v2377_v61, %v548_v42 }
 0x17a   : > { %v2393_v15 = vpop.eup %1740  ;;  %v643_v38 = vmax.f32 %v641_v63, %v642_v9  ;;  %v636_v18 = vrot.slane %v635_v37, 1  ;;  %v652_v52 = vrot.slane %v651_v43, 2  ;;  %v645_v4 = vmax.f32 %v2384_v41, %v644_v16 }
 0x17b   : > { %v2396_v1 = vpop.eup %1742  ;;  %v689_v23 = vsub.f32 %v2340_v44, %v547_v54  ;;  %v541_v2 = vmax.f32 %v539_v29, %v540_v46  ;;  %v557_v8 = vmax.f32 %v555_v36, %v556_v48  ;;  %v550_v3 = vrot.slane %v549_v17, 2 }
 0x17c   : > { %v2399_v5 = vpop.eup %1744  ;;  %v705_v6 = vsub.f32 %v2344_v45, %v643_v38  ;;  %v637_v58 = vmax.f32 %v635_v37, %v636_v18  ;;  %v653_v34 = vmax.f32 %v651_v43, %v652_v52  ;;  %v646_v25 = vrot.slane %v645_v4, 2 }
 0x17d   : > { %v2402_v39 = vpop.eup %1746  ;;  %v730_v63 = vmul.f32 1.442695, %v689_v23  ;;  %v688_v0 = vsub.f32 %v2350_v49, %v541_v2  ;;  %v558_v35 = vrot.slane %v557_v8, 1  ;;  %v551_v42 = vmax.f32 %v549_v17, %v550_v3 }
 0x17e   : > { %v2405_v9 = vpop.eup %1748  ;;  %v762_v44 = vmul.f32 1.442695, %v705_v6  ;;  %v704_v29 = vsub.f32 %v2356_v51, %v637_v58  ;;  %v654_v36 = vrot.slane %v653_v34, 1  ;;  %v647_v16 = vmax.f32 %v645_v4, %v646_v25 }
 0x17f   : > { %1750 = vpow2.f32 %v730_v63  ;;  %v728_v54 = vmul.f32 1.442695, %v688_v0  ;;  %v559_v45 = vmax.f32 %v557_v8, %v558_v35  ;;  %v552_v37 = vrot.slane %v551_v42, 1 }
 0x180   : > { %1752 = vpow2.f32 %v762_v44  ;;  %v760_v43 = vmul.f32 1.442695, %v704_v29  ;;  %v655_v46 = vmax.f32 %v653_v34, %v654_v36  ;;  %v648_v48 = vrot.slane %v647_v16, 1 }
 0x181   : > { %1754 = vpow2.f32 %v728_v54  ;;  %v691_v49 = vsub.f32 %v2365_v59, %v559_v45  ;;  %v553_v38 = vmax.f32 %v551_v42, %v552_v37  ;;  %v2411_v17 = vadd.f32 %v2280_v50, %v2182_v56 }
 0x182   : > { %1756 = vpow2.f32 %v760_v43  ;;  %v707_v51 = vsub.f32 %v2370_v7, %v655_v46  ;;  %v649_v18 = vmax.f32 %v647_v16, %v648_v48  ;;  %v2416_v52 = vadd.f32 %v2282_v53, %v2182_v56 }
 0x183   : > { %v734_v4 = vmul.f32 1.442695, %v691_v49  ;;  %v690_v23 = vsub.f32 %v2377_v61, %v553_v38  ;;  %v566_v2 = vrot.slane %v2411_v17, 4  ;;  %v2422_v59 = vadd.f32 %v2182_v56, %v2286_v55 }
 0x184   : > { %v766_v8 = vmul.f32 1.442695, %v707_v51  ;;  %v706_v50 = vsub.f32 %v2384_v41, %v649_v18  ;;  %v662_v3 = vrot.slane %v2416_v52, 4  ;;  %v2428_v7 = vadd.f32 %v2182_v56, %v2288_v57 }
 0x185   : > { %1758 = vpow2.f32 %v734_v4  ;;  %v732_v53 = vmul.f32 1.442695, %v690_v23  ;;  %v567_v6 = vmax.f32 %v2411_v17, %v566_v2  ;;  %v560_v61 = vrot.slane %v2422_v59, 4 }
 0x186   : > { %1760 = vpow2.f32 %v766_v8  ;;  %v764_v58 = vmul.f32 1.442695, %v706_v50  ;;  %v663_v55 = vmax.f32 %v2416_v52, %v662_v3  ;;  %v656_v34 = vrot.slane %v2428_v7, 4 }
 0x187   : > { %1762 = vpow2.f32 %v732_v53  ;;  %v568_v41 = vrot.slane %v567_v6, 2  ;;  %v561_v25 = vmax.f32 %v2422_v59, %v560_v61  ;;  %v2437_v57 = vadd.f32 %v2304_v12, %v2182_v56 }
 0x188   : > { %1764 = vpow2.f32 %v764_v58  ;;  %v664_v63 = vrot.slane %v663_v55, 2  ;;  %v657_v0 = vmax.f32 %v2428_v7, %v656_v34  ;;  %v2442_v35 = vadd.f32 %v2182_v56, %v2311_v22 }
 0x189   : > { %v2444_v42 = vpop.eup %1750  ;;  %v569_v44 = vmax.f32 %v567_v6, %v568_v41  ;;  %v562_v29 = vrot.slane %v561_v25, 2  ;;  %v578_v36 = vrot.slane %v2437_v57, 4  ;;  %v2449_v16 = vadd.f32 %v2306_v13, %v2182_v56 }
 0x18a   : > { %v2451_v12 = vpop.eup %1752  ;;  %v665_v54 = vmax.f32 %v663_v55, %v664_v63  ;;  %v658_v45 = vrot.slane %v657_v0, 2  ;;  %v572_v37 = vrot.slane %v2442_v35, 4  ;;  %v2456_v22 = vadd.f32 %v2182_v56, %v2313_v60 }
 0x18b   : > { %v2458_v43 = vpop.eup %1754  ;;  %v570_v46 = vrot.slane %v569_v44, 1  ;;  %v563_v48 = vmax.f32 %v561_v25, %v562_v29  ;;  %v579_v49 = vmax.f32 %v2437_v57, %v578_v36  ;;  %v674_v38 = vrot.slane %v2449_v16, 4 }
 0x18c   : > { %v2462_v13 = vpop.eup %1756  ;;  %v666_v51 = vrot.slane %v665_v54, 1  ;;  %v659_v18 = vmax.f32 %v657_v0, %v658_v45  ;;  %v573_v4 = vmax.f32 %v2442_v35, %v572_v37  ;;  %v668_v23 = vrot.slane %v2456_v22, 4 }
 0x18d   : > { %v571_v2 = vmax.f32 %v569_v44, %v570_v46  ;;  %v564_v8 = vrot.slane %v563_v48, 1  ;;  %v580_v56 = vrot.slane %v579_v49, 2  ;;  %v675_v60 = vmax.f32 %v2449_v16, %v674_v38 }
 0x18e   : > { %v667_v50 = vmax.f32 %v665_v54, %v666_v51  ;;  %v660_v3 = vrot.slane %v659_v18, 1  ;;  %v574_v53 = vrot.slane %v573_v4, 2  ;;  %v669_v6 = vmax.f32 %v2456_v22, %v668_v23 }
 0x18f   : > { %v2468_v61 = vpop.eup %1758  ;;  %v693_v58 = vsub.f32 %v2411_v17, %v571_v2  ;;  %v565_v55 = vmax.f32 %v563_v48, %v564_v8  ;;  %v581_v34 = vmax.f32 %v579_v49, %v580_v56  ;;  %v676_v41 = vrot.slane %v675_v60, 2 }
 0x190   : > { %v2471_v25 = vpop.eup %1760  ;;  %v709_v63 = vsub.f32 %v2416_v52, %v667_v50  ;;  %v661_v0 = vmax.f32 %v659_v18, %v660_v3  ;;  %v575_v44 = vmax.f32 %v573_v4, %v574_v53  ;;  %v670_v29 = vrot.slane %v669_v6, 2 }
 0x191   : > { %v2474_v36 = vpop.eup %1762  ;;  %v738_v54 = vmul.f32 1.442695, %v693_v58  ;;  %v692_v45 = vsub.f32 %v2422_v59, %v565_v55  ;;  %v582_v37 = vrot.slane %v581_v34, 1  ;;  %v677_v46 = vmax.f32 %v675_v60, %v676_v41 }
 0x192   : > { %v2477_v38 = vpop.eup %1764  ;;  %v770_v17 = vmul.f32 1.442695, %v709_v63  ;;  %v708_v48 = vsub.f32 %v2428_v7, %v661_v0  ;;  %v576_v49 = vrot.slane %v575_v44, 1  ;;  %v671_v51 = vmax.f32 %v669_v6, %v670_v29 }
 0x193   : > { %1766 = vpow2.f32 %v738_v54  ;;  %v736_v23 = vmul.f32 1.442695, %v692_v45  ;;  %v583_v52 = vmax.f32 %v581_v34, %v582_v37  ;;  %v678_v18 = vrot.slane %v677_v46, 1 }
 0x194   : > { %1768 = vpow2.f32 %v770_v17  ;;  %v768_v4 = vmul.f32 1.442695, %v708_v48  ;;  %v577_v2 = vmax.f32 %v575_v44, %v576_v49  ;;  %v672_v8 = vrot.slane %v671_v51, 1 }
 0x195   : > { %1770 = vpow2.f32 %v736_v23  ;;  %v695_v59 = vsub.f32 %v2437_v57, %v583_v52  ;;  %v679_v56 = vmax.f32 %v677_v46, %v678_v18  ;;  %v782_v60 = vrot.slane %v2308_v14, 4 }
 0x196   : > { %1772 = vpow2.f32 %v768_v4  ;;  %v694_v50 = vsub.f32 %v2442_v35, %v577_v2  ;;  %v673_v7 = vmax.f32 %v671_v51, %v672_v8  ;;  %v969_v3 = vmul.f32 %v2308_v14, %v2135_v26 }
 0x197   : > { %v742_v53 = vmul.f32 1.442695, %v695_v59  ;;  %v711_v6 = vsub.f32 %v2449_v16, %v679_v56  ;;  %v783_v58 = vadd.f32 %v2308_v14, %v782_v60  ;;  %v872_v55 = vrot.slane %v2321_v11, 4 }
 0x198   : > { %v740_v34 = vmul.f32 1.442695, %v694_v50  ;;  %v710_v57 = vsub.f32 %v2456_v22, %v673_v7  ;;  %v1006_v41 = vrot.slane %v969_v3, 4  ;;  %v984_v63 = vmul.f32 %v2321_v11, %v2131_v10 }
 0x199   : > { %1774 = vpow2.f32 %v742_v53  ;;  %v774_v35 = vmul.f32 1.442695, %v711_v6  ;;  %v784_v0 = vrot.slane %v783_v58, 2  ;;  %v873_v44 = vadd.f32 %v2321_v11, %v872_v55 }
 0x19a   : > { %1776 = vpow2.f32 %v740_v34  ;;  %v1007_v26 = vadd.f32 %v1006_v41, %v969_v3  ;;  %v1096_v29 = vrot.slane %v984_v63, 4  ;;  %v772_v16 = vmul.f32 1.442695, %v710_v57 }
 0x19b   : > { %v785_v54 = vadd.f32 %v784_v0, %v783_v58  ;;  %v874_v14 = vrot.slane %v873_v44, 2  ;;  %v878_v45 = vrot.slane %v2315_v24, 4  ;;  %1778 = vpow2.f32 %v774_v35 }
 0x19c   : > { %v1008_v37 = vrot.slane %v1007_v26, 2  ;;  %v1097_v22 = vadd.f32 %v1096_v29, %v984_v63  ;;  %v985_v46 = vmul.f32 %v2315_v24, %v2138_v27  ;;  %v794_v49 = vrot.slane %v2324_v47, 4  ;;  %v1846_v29 = vld [vmem:[%s2119_s4] sm:$0xff] }
 0x19d   : > { %v2495_v10 = vpop.eup %1766  ;;  %v786_v17 = vrot.slane %v785_v54, 1  ;;  %v875_v48 = vadd.f32 %v874_v14, %v873_v44  ;;  %v879_v11 = vadd.f32 %v2315_v24, %v878_v45  ;;  %v971_v4 = vmul.f32 %v2324_v47, %v2148_v30 }
 0x19e   : > { %v2499_v51 = vpop.eup %1768  ;;  %v1009_v23 = vadd.f32 %v1008_v37, %v1007_v26  ;;  %v1098_v52 = vrot.slane %v1097_v22, 2  ;;  %v1102_v18 = vrot.slane %v985_v46, 4  ;;  %v795_v56 = vadd.f32 %v2324_v47, %v794_v49 }
 0x19f   : > { %v2503_v2 = vpop.eup %1770  ;;  %v787_v8 = vadd.f32 %v786_v17, %v785_v54  ;;  %v876_v27 = vrot.slane %v875_v48, 1  ;;  %v880_v59 = vrot.slane %v879_v11, 2  ;;  %v1018_v3 = vrot.slane %v971_v4, 4 }
 0x1a0   : > { %v2506_v60 = vpop.eup %1772  ;;  %v1010_v24 = vrot.slane %v1009_v23, 1  ;;  %v1099_v50 = vadd.f32 %v1098_v52, %v1097_v22  ;;  %v1103_v7 = vadd.f32 %v1102_v18, %v985_v46  ;;  %v796_v58 = vrot.slane %v795_v56, 2 }
 0x1a1   : > { %1780 = vrcp.f32 %v787_v8  ;;  %v877_v53 = vadd.f32 %v876_v27, %v875_v48  ;;  %v881_v6 = vadd.f32 %v880_v59, %v879_v11  ;;  %v1019_v34 = vadd.f32 %v1018_v3, %v971_v4 }
 0x1a2   : > { %1782 = vpow2.f32 %v772_v16  ;;  %v1011_v30 = vadd.f32 %v1010_v24, %v1009_v23  ;;  %v1104_v55 = vrot.slane %v1103_v7, 2  ;;  %v797_v47 = vadd.f32 %v796_v58, %v795_v56 }
 0x1a3   : > { %v2508_v57 = vpop.eup %1774  ;;  %1784 = vrcp.f32 %v877_v53  ;;  %v882_v41 = vrot.slane %v881_v6, 1  ;;  %v776_v63 = vrot.slane %v2318_v33, 4  ;;  %v1100_v0 = vrot.slane %v1099_v50, 1 }
 0x1a4   : > { %v2511_v35 = vpop.eup %1776  ;;  %v1105_v44 = vadd.f32 %v1104_v55, %v1103_v7  ;;  %v1020_v26 = vrot.slane %v1019_v34, 2  ;;  %v968_v54 = vmul.f32 %v1846_v29, %v2318_v33  ;;  %v798_v16 = vrot.slane %v797_v47, 1 }
 0x1a5   : > { %v883_v14 = vadd.f32 %v882_v41, %v881_v6  ;;  %v777_v45 = vadd.f32 %v2318_v33, %v776_v63  ;;  %v788_v37 = vrot.slane %v2330_v19, 4  ;;  %v2517_v22 = vpop.eup %1778  ;;  %v970_v11 = vmul.f32 %v2330_v19, %v2141_v28 }
 0x1a6   : > { %v1106_v46 = vrot.slane %v1105_v44, 1  ;;  %v1021_v17 = vadd.f32 %v1020_v26, %v1019_v34  ;;  %v1000_v48 = vrot.slane %v968_v54, 4  ;;  %v799_v49 = vadd.f32 %v798_v16, %v797_v47 }
 0x1a7   : > { %1786 = vrcp.f32 %v883_v14  ;;  %v778_v23 = vrot.slane %v777_v45, 2  ;;  %v789_v52 = vadd.f32 %v2330_v19, %v788_v37  ;;  %v1101_v18 = vadd.f32 %v1100_v0, %v1099_v50 }
 0x1a8   : > { %v1107_v4 = vadd.f32 %v1106_v46, %v1105_v44  ;;  %v1001_v8 = vadd.f32 %v1000_v48, %v968_v54  ;;  %v1012_v27 = vrot.slane %v970_v11, 4  ;;  %1788 = vrcp.f32 %v799_v49  ;;  %v1847_v49 = vld [vmem:[%s2119_s4 + $0x90] sm:$0xff] }
 0x1a9   : > { %v779_v33 = vadd.f32 %v778_v23, %v777_v45  ;;  %v790_v59 = vrot.slane %v789_v52, 2  ;;  %v890_v56 = vrot.slane %v2327_v62, 4  ;;  %v1022_v24 = vrot.slane %v1021_v17, 1 }
 0x1aa   : > { %v1002_v7 = vrot.slane %v1001_v8, 2  ;;  %v1013_v3 = vadd.f32 %v1012_v27, %v970_v11  ;;  %v987_v28 = vmul.f32 %v2327_v62, %v2151_v31  ;;  %v884_v50 = vrot.slane %v2332_v21, 4 }
 0x1ab   : > { %v1781_v53 = vpop.eup %1780  ;;  %v780_v6 = vrot.slane %v779_v33, 1  ;;  %v791_v58 = vadd.f32 %v790_v59, %v789_v52  ;;  %v891_v19 = vadd.f32 %v2327_v62, %v890_v56  ;;  %v986_v23 = vmul.f32 %v1847_v49, %v2332_v21 }
 0x1ac   : > { %v2527_v55 = vpop.eup %1782  ;;  %v1225_v34 = vmul.f32 %v1781_v53, %v1011_v30  ;;  %v1003_v41 = vadd.f32 %v1002_v7, %v1001_v8  ;;  %v1014_v47 = vrot.slane %v1013_v3, 2  ;;  %v1114_v63 = vrot.slane %v987_v28, 4 }
 0x1ad   : > { %v1785_v0 = vpop.eup %1784  ;;  %v781_v44 = vadd.f32 %v780_v6, %v779_v33  ;;  %v792_v26 = vrot.slane %v791_v58, 1  ;;  %v892_v29 = vrot.slane %v891_v19, 2  ;;  %v885_v31 = vadd.f32 %v2332_v21, %v884_v50 }
 0x1ae   : > { %1258 = vadd.xlane.f32.xlu0 %v1225_v34  ;;  %v1240_v54 = vmul.f32 %v1785_v0, %v1101_v18  ;;  %v1004_v14 = vrot.slane %v1003_v41, 1  ;;  %v1015_v16 = vadd.f32 %v1014_v47, %v1013_v3  ;;  %v1115_v62 = vadd.f32 %v1114_v63, %v987_v28 }
 0x1af   : > { %1790 = vrcp.f32 %v781_v44  ;;  %v793_v45 = vadd.f32 %v792_v26, %v791_v58  ;;  %v893_v37 = vadd.f32 %v892_v29, %v891_v19  ;;  %v886_v46 = vrot.slane %v885_v31, 2  ;;  %v1849_v44 = vld [vmem:[%s2119_s4 + $0x20] sm:$0xff] }
 0x1b0   : > { %1288 = vadd.xlane.f32.xlu1 %v1240_v54  ;;  %v1023_v30 = vadd.f32 %v1022_v24, %v1021_v17  ;;  %v1016_v48 = vrot.slane %v1015_v16, 1  ;;  %v1116_v11 = vrot.slane %v1115_v62, 2  ;;  %v806_v18 = vrot.slane %v2372_v20, 4  ;;  %v1848_v24 = vld [vmem:[%s2119_s4 + $0x28] sm:$0xff] }
 0x1b1   : > { %v1787_v52 = vpop.eup %1786  ;;  %1792 = vrcp.f32 %v793_v45  ;;  %v894_v8 = vrot.slane %v893_v37, 1  ;;  %v887_v27 = vadd.f32 %v886_v46, %v885_v31  ;;  %v1005_v59 = vadd.f32 %v1004_v14, %v1003_v41 }
 0x1b2   : > { %v1241_v33 = vmul.f32 %v1787_v52, %v1107_v4  ;;  %v1117_v56 = vadd.f32 %v1116_v11, %v1115_v62  ;;  %v1108_v7 = vrot.slane %v986_v23, 4  ;;  %v1789_v3 = vpop.eup %1788  ;;  %v807_v17 = vadd.f32 %v2372_v20, %v806_v18  ;;  %v1850_v62 = vld [vmem:[%s2119_s4 + $0xa8] sm:$0xff] }
 0x1b3   : > { %v895_v28 = vadd.f32 %v894_v8, %v893_v37  ;;  %v888_v53 = vrot.slane %v887_v27, 1  ;;  %v973_v6 = vmul.f32 %v1848_v24, %v2372_v20  ;;  %v1227_v21 = vmul.f32 %v1789_v3, %v1023_v30 }
 0x1b4   : > { %1290 = vadd.xlane.f32.xlu0 %v1241_v33  ;;  %v1017_v58 = vadd.f32 %v1016_v48, %v1015_v16  ;;  %v1109_v19 = vadd.f32 %v1108_v7, %v986_v23  ;;  %v800_v50 = vrot.slane %v2390_v32, 4  ;;  %v808_v34 = vrot.slane %v807_v17, 2 }
 0x1b5   : > { %1794 = vrcp.f32 %v895_v28  ;;  %v889_v4 = vadd.f32 %v888_v53, %v887_v27  ;;  %v1030_v41 = vrot.slane %v973_v6, 4  ;;  %1262 = vadd.xlane.f32.xlu1 %v1227_v21  ;;  %v1118_v47 = vrot.slane %v1117_v56, 1 }
 0x1b6   : > { %v1110_v63 = vrot.slane %v1109_v19, 2  ;;  %v801_v0 = vadd.f32 %v2390_v32, %v800_v50  ;;  %v972_v26 = vmul.f32 %v1849_v44, %v2390_v32  ;;  %v809_v20 = vadd.f32 %v808_v34, %v807_v17  ;;  %v1851_v50 = vld [vmem:[%s2119_s4 + $0xb8] sm:$0xff] }
 0x1b7   : > { %1796 = vrcp.f32 %v889_v4  ;;  %v1031_v29 = vadd.f32 %v1030_v41, %v973_v6  ;;  %v902_v31 = vrot.slane %v2379_v40, 4  ;;  %v989_v45 = vmul.f32 %v1850_v62, %v2379_v40  ;;  %v1852_v62 = vld [vmem:[%s2119_s4 + $0xa0] sm:$0xff] }
 0x1b8   : > { %v1111_v54 = vadd.f32 %v1110_v63, %v1109_v19  ;;  %v802_v14 = vrot.slane %v801_v0, 2  ;;  %v1024_v16 = vrot.slane %v972_v26, 4  ;;  %v810_v46 = vrot.slane %v809_v20, 1 }
 0x1b9   : > { %v1791_v37 = vpop.eup %1790  ;;  %v1032_v30 = vrot.slane %v1031_v29, 2  ;;  %v903_v48 = vadd.f32 %v2379_v40, %v902_v31  ;;  %v914_v11 = vrot.slane %v2399_v5, 4  ;;  %v1126_v7 = vrot.slane %v989_v45, 4 }
 0x1ba   : > { %v1224_v49 = vmul.f32 %v1791_v37, %v1005_v59  ;;  %v1112_v32 = vrot.slane %v1111_v54, 1  ;;  %v803_v23 = vadd.f32 %v802_v14, %v801_v0  ;;  %v1025_v52 = vadd.f32 %v1024_v16, %v972_v26 }
 0x1bb   : > { %v1793_v8 = vpop.eup %1792  ;;  %v811_v27 = vadd.f32 %v810_v46, %v809_v20  ;;  %v1033_v18 = vadd.f32 %v1032_v30, %v1031_v29  ;;  %v904_v33 = vrot.slane %v903_v48, 2  ;;  %v1119_v28 = vadd.f32 %v1118_v47, %v1117_v56 }
 0x1bc   : > { %1256 = vadd.xlane.f32.xlu0 %v1224_v49  ;;  %v1226_v3 = vmul.f32 %v1793_v8, %v1017_v58  ;;  %v804_v53 = vrot.slane %v803_v23, 1  ;;  %v1026_v17 = vrot.slane %v1025_v52, 2  ;;  %v1127_v6 = vadd.f32 %v1126_v7, %v989_v45 }
 0x1bd   : > { %v1034_v24 = vrot.slane %v1033_v18, 1  ;;  %1798 = vrcp.f32 %v811_v27  ;;  %v905_v40 = vadd.f32 %v904_v33, %v903_v48  ;;  %v915_v19 = vadd.f32 %v2399_v5, %v914_v11 }
 0x1be   : > { %1260 = vadd.xlane.f32.xlu1 %v1226_v3  ;;  %v805_v59 = vadd.f32 %v804_v53, %v803_v23  ;;  %v1027_v21 = vadd.f32 %v1026_v17, %v1025_v52  ;;  %v991_v4 = vmul.f32 %v1851_v50, %v2399_v5  ;;  %v1113_v41 = vadd.f32 %v1112_v32, %v1111_v54  ;;  %v1853_v32 = vld [vmem:[%s2119_s4 + $0xb0] sm:$0xff] }
 0x1bf   : > { %v1795_v34 = vpop.eup %1794  ;;  %v906_v63 = vrot.slane %v905_v40, 1  ;;  %v1128_v58 = vrot.slane %v1127_v6, 2  ;;  %v896_v56 = vrot.slane %v2393_v15, 4  ;;  %v916_v44 = vrot.slane %v915_v19, 2 }
 0x1c0   : > { %v1243_v47 = vmul.f32 %v1795_v34, %v1119_v28  ;;  %v1028_v0 = vrot.slane %v1027_v21, 1  ;;  %1800 = vrcp.f32 %v805_v59  ;;  %v1138_v31 = vrot.slane %v991_v4, 4 }
 0x1c1   : > { %v1797_v26 = vpop.eup %1796  ;;  %v907_v20 = vadd.f32 %v906_v63, %v905_v40  ;;  %v1129_v29 = vadd.f32 %v1128_v58, %v1127_v6  ;;  %v897_v14 = vadd.f32 %v2393_v15, %v896_v56  ;;  %v1035_v16 = vadd.f32 %v1034_v24, %v1033_v18  ;;  %v1854_v40 = vld [vmem:[%s2119_s4 + $0x38] sm:$0xff] }
 0x1c2   : > { %1294 = vadd.xlane.f32.xlu0 %v1243_v47  ;;  %v1242_v5 = vmul.f32 %v1797_v26, %v1113_v41  ;;  %v917_v54 = vadd.f32 %v916_v44, %v915_v19  ;;  %v988_v45 = vmul.f32 %v1852_v62, %v2393_v15  ;;  %v1029_v37 = vadd.f32 %v1028_v0, %v1027_v21  ;;  %v1855_v62 = vld [vmem:[%s2119_s4 + $0xc8] sm:$0xff] }
 0x1c3   : > { %1802 = vrcp.f32 %v907_v20  ;;  %v1139_v46 = vadd.f32 %v1138_v31, %v991_v4  ;;  %v898_v30 = vrot.slane %v897_v14, 2  ;;  %v908_v49 = vrot.slane %v2405_v9, 4 }
 0x1c4   : > { %1292 = vadd.xlane.f32.xlu1 %v1242_v5  ;;  %v918_v48 = vrot.slane %v917_v54, 1  ;;  %v1120_v11 = vrot.slane %v988_v45, 4  ;;  %v990_v23 = vmul.f32 %v1853_v32, %v2405_v9  ;;  %v1130_v52 = vrot.slane %v1129_v29, 1 }
 0x1c5   : > { %v1140_v8 = vrot.slane %v1139_v46, 2  ;;  %v899_v27 = vadd.f32 %v898_v30, %v897_v14  ;;  %v818_v18 = vrot.slane %v2396_v1, 4  ;;  %v909_v7 = vadd.f32 %v2405_v9, %v908_v49 }
 0x1c6   : > { %v919_v33 = vadd.f32 %v918_v48, %v917_v54  ;;  %v1121_v15 = vadd.f32 %v1120_v11, %v988_v45  ;;  %v1132_v3 = vrot.slane %v990_v23, 4  ;;  %v975_v6 = vmul.f32 %v1854_v40, %v2396_v1 }
 0x1c7   : > { %v1799_v28 = vpop.eup %1798  ;;  %v1141_v53 = vadd.f32 %v1140_v8, %v1139_v46  ;;  %v900_v17 = vrot.slane %v899_v27, 1  ;;  %v819_v24 = vadd.f32 %v2396_v1, %v818_v18  ;;  %v910_v19 = vrot.slane %v909_v7, 2 }
 0x1c8   : > { %v1229_v59 = vmul.f32 %v1799_v28, %v1035_v16  ;;  %1804 = vrcp.f32 %v919_v33  ;;  %v1122_v21 = vrot.slane %v1121_v15, 2  ;;  %v1133_v34 = vadd.f32 %v1132_v3, %v990_v23 }
 0x1c9   : > { %v1142_v50 = vrot.slane %v1141_v53, 1  ;;  %v901_v4 = vadd.f32 %v900_v17, %v899_v27  ;;  %v820_v41 = vrot.slane %v819_v24, 2  ;;  %v911_v58 = vadd.f32 %v910_v19, %v909_v7  ;;  %v1856_v27 = vld [vmem:[%s2119_s4 + $0x30] sm:$0xff] }
 0x1ca   : > { %v1801_v63 = vpop.eup %1800  ;;  %1266 = vadd.xlane.f32.xlu0 %v1229_v59  ;;  %v1123_v9 = vadd.f32 %v1122_v21, %v1121_v15  ;;  %v1042_v56 = vrot.slane %v975_v6, 4  ;;  %v926_v47 = vrot.slane %v2451_v12, 4  ;;  %v1131_v44 = vadd.f32 %v1130_v52, %v1129_v29 }
 0x1cb   : > { %v1228_v0 = vmul.f32 %v1801_v63, %v1029_v37  ;;  %1806 = vrcp.f32 %v901_v4  ;;  %v1134_v1 = vrot.slane %v1133_v34, 2  ;;  %v912_v20 = vrot.slane %v911_v58, 1 }
 0x1cc   : > { %v1124_v26 = vrot.slane %v1123_v9, 1  ;;  %v821_v31 = vadd.f32 %v820_v41, %v819_v24  ;;  %v1043_v14 = vadd.f32 %v1042_v56, %v975_v6  ;;  %v927_v54 = vadd.f32 %v2451_v12, %v926_v47 }
 0x1cd   : > { %v1803_v5 = vpop.eup %1802  ;;  %1264 = vadd.xlane.f32.xlu1 %v1228_v0  ;;  %v1135_v16 = vadd.f32 %v1134_v1, %v1133_v34  ;;  %v993_v45 = vmul.f32 %v1855_v62, %v2451_v12  ;;  %v812_v46 = vrot.slane %v2402_v39, 4  ;;  %v1143_v37 = vadd.f32 %v1142_v50, %v1141_v53 }
 0x1ce   : > { %v1245_v30 = vmul.f32 %v1803_v5, %v1131_v44  ;;  %v913_v29 = vadd.f32 %v912_v20, %v911_v58  ;;  %v822_v48 = vrot.slane %v821_v31, 1  ;;  %v1044_v49 = vrot.slane %v1043_v14, 2  ;;  %v1858_v5 = vld [vmem:[%s2119_s4 + $0x48] sm:$0xff] }
 0x1cf   : > { %v1136_v11 = vrot.slane %v1135_v16, 1  ;;  %v928_v32 = vrot.slane %v927_v54, 2  ;;  %v1150_v23 = vrot.slane %v993_v45, 4  ;;  %v813_v8 = vadd.f32 %v2402_v39, %v812_v46 }
 0x1d0   : > { %1298 = vadd.xlane.f32.xlu0 %v1245_v30  ;;  %1808 = vrcp.f32 %v913_v29  ;;  %v823_v52 = vadd.f32 %v822_v48, %v821_v31  ;;  %v974_v18 = vmul.f32 %v1856_v27, %v2402_v39  ;;  %v1125_v33 = vadd.f32 %v1124_v26, %v1123_v9  ;;  %v1857_v39 = vld [vmem:[%s2119_s4 + $0x40] sm:$0xff] }
 0x1d1   : > { %v1045_v12 = vadd.f32 %v1044_v49, %v1043_v14  ;;  %v929_v15 = vadd.f32 %v928_v32, %v927_v54  ;;  %v1151_v7 = vadd.f32 %v1150_v23, %v993_v45  ;;  %v814_v28 = vrot.slane %v813_v8, 2 }
 0x1d2   : > { %v1805_v3 = vpop.eup %1804  ;;  %1810 = vrcp.f32 %v823_v52  ;;  %v1036_v53 = vrot.slane %v974_v18, 4  ;;  %v824_v17 = vrot.slane %v2458_v43, 4  ;;  %v1137_v40 = vadd.f32 %v1136_v11, %v1135_v16 }
 0x1d3   : > { %v1247_v24 = vmul.f32 %v1805_v3, %v1143_v37  ;;  %v930_v6 = vrot.slane %v929_v15, 1  ;;  %v1152_v59 = vrot.slane %v1151_v7, 2  ;;  %v815_v21 = vadd.f32 %v814_v28, %v813_v8 }
 0x1d4   : > { %v1037_v19 = vadd.f32 %v1036_v53, %v974_v18  ;;  %v825_v50 = vadd.f32 %v2458_v43, %v824_v17  ;;  %v976_v4 = vmul.f32 %v1857_v39, %v2458_v43  ;;  %v1046_v41 = vrot.slane %v1045_v12, 1  ;;  %v1859_v18 = vld [vmem:[%s2119_s4 + $0xd8] sm:$0xff] }
 0x1d5   : > { %v1807_v34 = vpop.eup %1806  ;;  %1302 = vadd.xlane.f32.xlu1 %v1247_v24  ;;  %v931_v63 = vadd.f32 %v930_v6, %v929_v15  ;;  %v1153_v9 = vadd.f32 %v1152_v59, %v1151_v7  ;;  %v830_v58 = vrot.slane %v2444_v42, 4  ;;  %v816_v47 = vrot.slane %v815_v21, 1  ;;  %v1860_v59 = vld [vmem:[%s2119_s4 + $0xc0] sm:$0xff] }
 0x1d6   : > { %v1244_v56 = vmul.f32 %v1807_v34, %v1125_v33  ;;  %v1038_v0 = vrot.slane %v1037_v19, 2  ;;  %v826_v44 = vrot.slane %v825_v50, 2  ;;  %v1048_v26 = vrot.slane %v976_v4, 4 }
 0x1d7   : > { %v1154_v1 = vrot.slane %v1153_v9, 1  ;;  %1812 = vrcp.f32 %v931_v63  ;;  %v831_v20 = vadd.f32 %v2444_v42, %v830_v58  ;;  %v817_v31 = vadd.f32 %v816_v47, %v815_v21 }
 0x1d8   : > { %1296 = vadd.xlane.f32.xlu0 %v1244_v56  ;;  %v1039_v43 = vadd.f32 %v1038_v0, %v1037_v19  ;;  %v827_v14 = vadd.f32 %v826_v44, %v825_v50  ;;  %v977_v16 = vmul.f32 %v1858_v5, %v2444_v42  ;;  %v1047_v54 = vadd.f32 %v1046_v41, %v1045_v12 }
 0x1d9   : > { %v1049_v62 = vadd.f32 %v1048_v26, %v976_v4  ;;  %v832_v45 = vrot.slane %v831_v20, 2  ;;  %v938_v46 = vrot.slane %v2471_v25, 4  ;;  %v1155_v37 = vadd.f32 %v1154_v1, %v1153_v9  ;;  %v1861_v26 = vld [vmem:[%s2119_s4 + $0xd0] sm:$0xff] }
 0x1da   : > { %v1809_v30 = vpop.eup %1808  ;;  %1814 = vrcp.f32 %v817_v31  ;;  %v828_v29 = vrot.slane %v827_v14, 1  ;;  %v1054_v48 = vrot.slane %v977_v16, 4  ;;  %v1040_v8 = vrot.slane %v1039_v43, 1 }
 0x1db   : > { %v1246_v11 = vmul.f32 %v1809_v30, %v1137_v40  ;;  %v1050_v49 = vrot.slane %v1049_v62, 2  ;;  %v833_v32 = vadd.f32 %v832_v45, %v831_v20  ;;  %v939_v23 = vadd.f32 %v2471_v25, %v938_v46 }
 0x1dc   : > { %v1811_v52 = vpop.eup %1810  ;;  %v829_v27 = vadd.f32 %v828_v29, %v827_v14  ;;  %v1055_v42 = vadd.f32 %v1054_v48, %v977_v16  ;;  %v995_v33 = vmul.f32 %v1859_v18, %v2471_v25  ;;  %v920_v17 = vrot.slane %v2462_v13, 4  ;;  %v1862_v48 = vld [vmem:[%s2119_s4 + $0x58] sm:$0xff] }
 0x1dd   : > { %1300 = vadd.xlane.f32.xlu1 %v1246_v11  ;;  %v1231_v12 = vmul.f32 %v1811_v52, %v1047_v54  ;;  %v1051_v15 = vadd.f32 %v1050_v49, %v1049_v62  ;;  %v834_v7 = vrot.slane %v833_v32, 1  ;;  %v940_v3 = vrot.slane %v939_v23, 2 }
 0x1de   : > { %1816 = vrcp.f32 %v829_v27  ;;  %v1056_v28 = vrot.slane %v1055_v42, 2  ;;  %v1162_v53 = vrot.slane %v995_v33, 4  ;;  %v992_v21 = vmul.f32 %v1860_v59, %v2462_v13 }
 0x1df   : > { %1270 = vadd.xlane.f32.xlu0 %v1231_v12  ;;  %v1052_v24 = vrot.slane %v1051_v15, 1  ;;  %v835_v40 = vadd.f32 %v834_v7, %v833_v32  ;;  %v941_v6 = vadd.f32 %v940_v3, %v939_v23  ;;  %v921_v50 = vadd.f32 %v2462_v13, %v920_v17 }
 0x1e0   : > { %v1057_v19 = vadd.f32 %v1056_v28, %v1055_v42  ;;  %v1163_v25 = vadd.f32 %v1162_v53, %v995_v33  ;;  %v932_v39 = vrot.slane %v2477_v38, 4  ;;  %v1041_v34 = vadd.f32 %v1040_v8, %v1039_v43 }
 0x1e1   : > { %v1813_v4 = vpop.eup %1812  ;;  %1818 = vrcp.f32 %v835_v40  ;;  %v942_v41 = vrot.slane %v941_v6, 1  ;;  %v1144_v63 = vrot.slane %v992_v21, 4  ;;  %v1053_v58 = vadd.f32 %v1052_v24, %v1051_v15  ;;  %v1863_v24 = vld [vmem:[%s2119_s4 + $0x68] sm:$0xff] }
 0x1e2   : > { %v1249_v9 = vmul.f32 %v1813_v4, %v1155_v37  ;;  %v1164_v56 = vrot.slane %v1163_v25, 2  ;;  %v922_v47 = vrot.slane %v921_v50, 2  ;;  %v933_v1 = vadd.f32 %v2477_v38, %v932_v39 }
 0x1e3   : > { %v943_v0 = vadd.f32 %v942_v41, %v941_v6  ;;  %v1145_v44 = vadd.f32 %v1144_v63, %v992_v21  ;;  %v994_v20 = vmul.f32 %v1861_v26, %v2477_v38  ;;  %v1058_v13 = vrot.slane %v1057_v19, 1  ;;  %v1864_v63 = vld [vmem:[%s2119_s4 + $0x50] sm:$0xff] }
 0x1e4   : > { %v1815_v31 = vpop.eup %1814  ;;  %1306 = vadd.xlane.f32.xlu1 %v1249_v9  ;;  %v1165_v14 = vadd.f32 %v1164_v56, %v1163_v25  ;;  %v923_v43 = vadd.f32 %v922_v47, %v921_v50  ;;  %v842_v5 = vrot.slane %v2468_v61, 4  ;;  %v934_v62 = vrot.slane %v933_v1, 2 }
 0x1e5   : > { %v1230_v16 = vmul.f32 %v1815_v31, %v1041_v34  ;;  %1820 = vrcp.f32 %v943_v0  ;;  %v1146_v54 = vrot.slane %v1145_v44, 2  ;;  %v1156_v30 = vrot.slane %v994_v20, 4 }
 0x1e6   : > { %v1166_v45 = vrot.slane %v1165_v14, 1  ;;  %v924_v46 = vrot.slane %v923_v43, 1  ;;  %v843_v37 = vadd.f32 %v2468_v61, %v842_v5  ;;  %v935_v38 = vadd.f32 %v934_v62, %v933_v1 }
 0x1e7   : > { %1268 = vadd.xlane.f32.xlu0 %v1230_v16  ;;  %v1147_v29 = vadd.f32 %v1146_v54, %v1145_v44  ;;  %v979_v11 = vmul.f32 %v1862_v48, %v2468_v61  ;;  %v854_v49 = vrot.slane %v2495_v10, 4  ;;  %v1059_v23 = vadd.f32 %v1058_v13, %v1057_v19  ;;  %v1865_v16 = vld [vmem:[%s2119_s4 + $0x60] sm:$0xff] }
 0x1e8   : > { %v1817_v32 = vpop.eup %1816  ;;  %v925_v52 = vadd.f32 %v924_v46, %v923_v43  ;;  %v1157_v8 = vadd.f32 %v1156_v30, %v994_v20  ;;  %v844_v27 = vrot.slane %v843_v37, 2  ;;  %v1167_v18 = vadd.f32 %v1166_v45, %v1165_v14 }
 0x1e9   : > { %v1232_v42 = vmul.f32 %v1817_v32, %v1053_v58  ;;  %v936_v33 = vrot.slane %v935_v38, 1  ;;  %v1066_v12 = vrot.slane %v979_v11, 4  ;;  %v855_v3 = vadd.f32 %v2495_v10, %v854_v49 }
 0x1ea   : > { %1822 = vrcp.f32 %v925_v52  ;;  %v1158_v15 = vrot.slane %v1157_v8, 2  ;;  %v845_v7 = vadd.f32 %v844_v27, %v843_v37  ;;  %v1148_v61 = vrot.slane %v1147_v29, 1  ;;  %v1866_v27 = vld [vmem:[%s2119_s4 + $0xe8] sm:$0xff] }
 0x1eb   : > { %v1819_v28 = vpop.eup %1818  ;;  %1272 = vadd.xlane.f32.xlu1 %v1232_v42  ;;  %v937_v53 = vadd.f32 %v936_v33, %v935_v38  ;;  %v1067_v17 = vadd.f32 %v1066_v12, %v979_v11  ;;  %v981_v40 = vmul.f32 %v1863_v24, %v2495_v10  ;;  %v856_v19 = vrot.slane %v855_v3, 2 }
 0x1ec   : > { %v1233_v6 = vmul.f32 %v1819_v28, %v1059_v23  ;;  %v1159_v59 = vadd.f32 %v1158_v15, %v1157_v8  ;;  %v846_v21 = vrot.slane %v845_v7, 1  ;;  %v836_v39 = vrot.slane %v2474_v36, 4 }
 0x1ed   : > { %1824 = vrcp.f32 %v937_v53  ;;  %v1068_v25 = vrot.slane %v1067_v17, 2  ;;  %v1078_v50 = vrot.slane %v981_v40, 4  ;;  %v857_v41 = vadd.f32 %v856_v19, %v855_v3  ;;  %v1867_v19 = vld [vmem:[%s2119_s4 + $0xe0] sm:$0xff] }
 0x1ee   : > { %1274 = vadd.xlane.f32.xlu0 %v1233_v6  ;;  %v1160_v4 = vrot.slane %v1159_v59, 1  ;;  %v847_v34 = vadd.f32 %v846_v21, %v845_v7  ;;  %v978_v9 = vmul.f32 %v1864_v63, %v2474_v36  ;;  %v837_v47 = vadd.f32 %v2474_v36, %v836_v39 }
 0x1ef   : > { %v1821_v58 = vpop.eup %1820  ;;  %v1069_v56 = vadd.f32 %v1068_v25, %v1067_v17  ;;  %v1079_v10 = vadd.f32 %v1078_v50, %v981_v40  ;;  %v848_v0 = vrot.slane %v2503_v2, 4  ;;  %v1149_v1 = vadd.f32 %v1148_v61, %v1147_v29 }
 0x1f0   : > { %v1251_v44 = vmul.f32 %v1821_v58, %v1167_v18  ;;  %1826 = vrcp.f32 %v847_v34  ;;  %v858_v26 = vrot.slane %v857_v41, 1  ;;  %v838_v13 = vrot.slane %v837_v47, 2 }
 0x1f1   : > { %v1070_v20 = vrot.slane %v1069_v56, 1  ;;  %v1080_v31 = vrot.slane %v1079_v10, 2  ;;  %v1060_v14 = vrot.slane %v978_v9, 4  ;;  %v849_v5 = vadd.f32 %v2503_v2, %v848_v0 }
 0x1f2   : > { %1310 = vadd.xlane.f32.xlu1 %v1251_v44  ;;  %v859_v43 = vadd.f32 %v858_v26, %v857_v41  ;;  %v980_v54 = vmul.f32 %v1865_v16, %v2503_v2  ;;  %v950_v62 = vrot.slane %v2499_v51, 4  ;;  %v1161_v36 = vadd.f32 %v1160_v4, %v1159_v59 }
 0x1f3   : > { %v1081_v45 = vadd.f32 %v1080_v31, %v1079_v10  ;;  %v839_v46 = vadd.f32 %v838_v13, %v837_v47  ;;  %v1061_v30 = vadd.f32 %v1060_v14, %v978_v9  ;;  %v850_v29 = vrot.slane %v849_v5, 2  ;;  %v1868_v47 = vld [vmem:[%s2119_s4 + $0x78] sm:$0xff] }
 0x1f4   : > { %v1823_v37 = vpop.eup %1822  ;;  %1828 = vrcp.f32 %v859_v43  ;;  %v1072_v38 = vrot.slane %v980_v54, 4  ;;  %v951_v48 = vadd.f32 %v2499_v51, %v950_v62  ;;  %v1071_v49 = vadd.f32 %v1070_v20, %v1069_v56 }
 0x1f5   : > { %v1248_v11 = vmul.f32 %v1823_v37, %v1149_v1  ;;  %v840_v32 = vrot.slane %v839_v46, 1  ;;  %v1062_v23 = vrot.slane %v1061_v30, 2  ;;  %v851_v52 = vadd.f32 %v850_v29, %v849_v5 }
 0x1f6   : > { %v1073_v8 = vadd.f32 %v1072_v38, %v980_v54  ;;  %v952_v2 = vrot.slane %v951_v48, 2  ;;  %v997_v42 = vmul.f32 %v1866_v27, %v2499_v51  ;;  %v1082_v33 = vrot.slane %v1081_v45, 1  ;;  %v1869_v54 = vld [vmem:[%s2119_s4 + $0x70] sm:$0xff] }
 0x1f7   : > { %v1825_v18 = vpop.eup %1824  ;;  %1304 = vadd.xlane.f32.xlu0 %v1248_v11  ;;  %v841_v12 = vadd.f32 %v840_v32, %v839_v46  ;;  %v1063_v15 = vadd.f32 %v1062_v23, %v1061_v30  ;;  %v944_v7 = vrot.slane %v2506_v60, 4  ;;  %v852_v28 = vrot.slane %v851_v52, 1 }
 0x1f8   : > { %v1250_v3 = vmul.f32 %v1825_v18, %v1161_v36  ;;  %v1074_v61 = vrot.slane %v1073_v8, 2  ;;  %v953_v53 = vadd.f32 %v952_v2, %v951_v48  ;;  %v1174_v24 = vrot.slane %v997_v42, 4  ;;  %v1870_v18 = vld [vmem:[%s2119_s4 + $0xf0] sm:$0xff] }
 0x1f9   : > { %v1064_v17 = vrot.slane %v1063_v15, 1  ;;  %1830 = vrcp.f32 %v841_v12  ;;  %v945_v40 = vadd.f32 %v2506_v60, %v944_v7  ;;  %v853_v51 = vadd.f32 %v852_v28, %v851_v52 }
 0x1fa   : > { %v1827_v6 = vpop.eup %1826  ;;  %1308 = vadd.xlane.f32.xlu1 %v1250_v3  ;;  %v1075_v59 = vadd.f32 %v1074_v61, %v1073_v8  ;;  %v954_v21 = vrot.slane %v953_v53, 1  ;;  %v996_v25 = vmul.f32 %v1867_v19, %v2506_v60  ;;  %v1083_v39 = vadd.f32 %v1082_v33, %v1081_v45 }
 0x1fb   : > { %v1235_v50 = vmul.f32 %v1827_v6, %v1071_v49  ;;  %v1175_v4 = vadd.f32 %v1174_v24, %v997_v42  ;;  %v946_v34 = vrot.slane %v945_v40, 2  ;;  %v1065_v41 = vadd.f32 %v1064_v17, %v1063_v15 }
 0x1fc   : > { %1832 = vrcp.f32 %v853_v51  ;;  %v955_v63 = vadd.f32 %v954_v21, %v953_v53  ;;  %v1168_v9 = vrot.slane %v996_v25, 4  ;;  %v866_v10 = vrot.slane %v2508_v57, 4 }
 0x1fd   : > { %1278 = vadd.xlane.f32.xlu0 %v1235_v50  ;;  %v1176_v58 = vrot.slane %v1175_v4, 2  ;;  %v947_v56 = vadd.f32 %v946_v34, %v945_v40  ;;  %v983_v0 = vmul.f32 %v1868_v47, %v2508_v57  ;;  %v1076_v1 = vrot.slane %v1075_v59, 1  ;;  %v1871_v34 = vld [vmem:[%s2119_s4 + $0xf8] sm:$0xff] }
 0x1fe   : > { %v1829_v44 = vpop.eup %1828  ;;  %1834 = vrcp.f32 %v955_v63  ;;  %v1169_v60 = vadd.f32 %v1168_v9, %v996_v25  ;;  %v860_v26 = vrot.slane %v2511_v35, 4  ;;  %v867_v14 = vadd.f32 %v2508_v57, %v866_v10 }
 0x1ff   : > { %v1237_v20 = vmul.f32 %v1829_v44, %v1083_v39  ;;  %v1177_v31 = vadd.f32 %v1176_v58, %v1175_v4  ;;  %v948_v13 = vrot.slane %v947_v56, 1  ;;  %v1090_v5 = vrot.slane %v983_v0, 4 }
 0x200   : > { %v1170_v43 = vrot.slane %v1169_v60, 2  ;;  %v861_v16 = vadd.f32 %v2511_v35, %v860_v26  ;;  %v982_v62 = vmul.f32 %v1869_v54, %v2511_v35  ;;  %v868_v46 = vrot.slane %v867_v14, 2 }
 0x201   : > { %1282 = vadd.xlane.f32.xlu1 %v1237_v20  ;;  %v1178_v36 = vrot.slane %v1177_v31, 1  ;;  %v949_v45 = vadd.f32 %v948_v13, %v947_v56  ;;  %v956_v30 = vrot.slane %v2527_v55, 4  ;;  %v1091_v29 = vadd.f32 %v1090_v5, %v983_v0 }
 0x202   : > { %v1171_v37 = vadd.f32 %v1170_v43, %v1169_v60  ;;  %v862_v38 = vrot.slane %v861_v16, 2  ;;  %v1084_v48 = vrot.slane %v982_v62, 4  ;;  %v1077_v57 = vadd.f32 %v1076_v1, %v1075_v59 }
 0x203   : > { %v1831_v11 = vpop.eup %1830  ;;  %1836 = vrcp.f32 %v949_v45  ;;  %v869_v49 = vadd.f32 %v868_v46, %v867_v14  ;;  %v957_v32 = vadd.f32 %v2527_v55, %v956_v30  ;;  %v1179_v52 = vadd.f32 %v1178_v36, %v1177_v31 }
 0x204   : > { %v1234_v23 = vmul.f32 %v1831_v11, %v1065_v41  ;;  %v1092_v35 = vrot.slane %v1091_v29, 2  ;;  %v863_v8 = vadd.f32 %v862_v38, %v861_v16  ;;  %v1085_v27 = vadd.f32 %v1084_v48, %v982_v62 }
 0x205   : > { %v870_v2 = vrot.slane %v869_v49, 1  ;;  %v958_v42 = vrot.slane %v957_v32, 2  ;;  %v998_v33 = vmul.f32 %v1870_v18, %v2527_v55  ;;  %v1172_v15 = vrot.slane %v1171_v37, 1 }
 0x206   : > { %v1833_v12 = vpop.eup %1832  ;;  %1276 = vadd.xlane.f32.xlu0 %v1234_v23  ;;  %v864_v7 = vrot.slane %v863_v8, 1  ;;  %v962_v3 = vrot.slane %v2517_v22, 4  ;;  %v1086_v53 = vrot.slane %v1085_v27, 2  ;;  %v1093_v40 = vadd.f32 %v1092_v35, %v1091_v29 }
 0x207   : > { %v1236_v28 = vmul.f32 %v1833_v12, %v1077_v57  ;;  %v871_v61 = vadd.f32 %v870_v2, %v869_v49  ;;  %v959_v17 = vadd.f32 %v958_v42, %v957_v32  ;;  %v1180_v51 = vrot.slane %v998_v33, 4 }
 0x208   : > { %v1835_v24 = vpop.eup %1834  ;;  %v865_v6 = vadd.f32 %v864_v7, %v863_v8  ;;  %v963_v59 = vadd.f32 %v2517_v22, %v962_v3  ;;  %v1087_v55 = vadd.f32 %v1086_v53, %v1085_v27  ;;  %v1173_v25 = vadd.f32 %v1172_v15, %v1171_v37 }
 0x209   : > { %1280 = vadd.xlane.f32.xlu1 %v1236_v28  ;;  %v1253_v21 = vmul.f32 %v1835_v24, %v1179_v52  ;;  %1838 = vrcp.f32 %v871_v61  ;;  %v960_v19 = vrot.slane %v959_v17, 1  ;;  %v1181_v50 = vadd.f32 %v1180_v51, %v998_v33 }
 0x20a   : > { %1840 = vrcp.f32 %v865_v6  ;;  %v964_v39 = vrot.slane %v963_v59, 2  ;;  %v999_v41 = vmul.f32 %v1871_v34, %v2517_v22  ;;  %v1094_v63 = vrot.slane %v1093_v40, 1 }
 0x20b   : > { %1314 = vadd.xlane.f32.xlu0 %v1253_v21  ;;  %v961_v4 = vadd.f32 %v960_v19, %v959_v17  ;;  %v1182_v9 = vrot.slane %v1181_v50, 2  ;;  %v1088_v10 = vrot.slane %v1087_v55, 1 }
 0x20c   : > { %v965_v58 = vadd.f32 %v964_v39, %v963_v59  ;;  %v1186_v47 = vrot.slane %v999_v41, 4  ;;  %v1095_v26 = vadd.f32 %v1094_v63, %v1093_v40 }
 0x20d   : > { %v1837_v56 = vpop.eup %1836  ;;  %1842 = vrcp.f32 %v961_v4  ;;  %v1183_v44 = vadd.f32 %v1182_v9, %v1181_v50  ;;  %v1089_v13 = vadd.f32 %v1088_v10, %v1087_v55 }
 0x20e   : > { %v1252_v0 = vmul.f32 %v1837_v56, %v1173_v25  ;;  %v966_v1 = vrot.slane %v965_v58, 1  ;;  %v1187_v60 = vadd.f32 %v1186_v47, %v999_v41 }
 0x20f   : > { %v1184_v20 = vrot.slane %v1183_v44, 1 }
 0x210   : > { %1312 = vadd.xlane.f32.xlu1 %v1252_v0  ;;  %v967_v31 = vadd.f32 %v966_v1, %v965_v58  ;;  %v1188_v14 = vrot.slane %v1187_v60, 2 }
 0x211   : > { %v1185_v54 = vadd.f32 %v1184_v20, %v1183_v44 }
 0x212   : > { %1844 = vrcp.f32 %v967_v31  ;;  %v1189_v22 = vadd.f32 %v1188_v14, %v1187_v60 }
 0x213   : > { %v1839_v43 = vpop.eup %1838 }
 0x214   : > { %v1841_v5 = vpop.eup %1840  ;;  %v1239_v16 = vmul.f32 %v1839_v43, %v1095_v26  ;;  %v1190_v36 = vrot.slane %v1189_v22, 1 }
 0x215   : > { %v1238_v62 = vmul.f32 %v1841_v5, %v1089_v13 }
 0x216   : > { %1286 = vadd.xlane.f32.xlu0 %v1239_v16  ;;  %v1191_v30 = vadd.f32 %v1190_v36, %v1189_v22 }
 0x217   : > { %v1843_v45 = vpop.eup %1842  ;;  %1284 = vadd.xlane.f32.xlu1 %v1238_v62 }
 0x218   : > { %v1254_v46 = vmul.f32 %v1843_v45, %v1185_v54 }
 0x21a   : > { %1316 = vadd.xlane.f32.xlu0 %v1254_v46 }
 0x21c   : > { %v1845_v37 = vpop.eup %1844 }
 0x21d   : > { %v1255_v29 = vmul.f32 %v1845_v37, %v1191_v30 }
 0x21f   : > { %1318 = vadd.xlane.f32.xlu1 %v1255_v29 }
 0x23b   : > { %v1259_v48 = vpop.xlane.xlu0 %1258 }
 0x23d   : > { %v1289_v38 = vpop.xlane.xlu1 %1288 }
 0x241   : > { %v1291_v57 = vpop.xlane.xlu0 %1290 }
 0x242   : > { %v1263_v11 = vpop.xlane.xlu1 %1262  ;;  %v1373_v23 = vsel %vm1352_vm0, %v1291_v57, %v1289_v38 }
 0x249   : > { %v1257_v32 = vpop.xlane.xlu0 %1256 }
 0x24a   : > { %v1353_v12 = vsel %vm1352_vm0, %v1259_v48, %v1257_v32 }
 0x24b   : > { %v1261_v49 = vpop.xlane.xlu1 %1260 }
 0x24c   : > { %v1355_v15 = vsel %vm1354_vm1, %v1261_v49, %v1353_v12 }
 0x24d   : > { %v1357_v28 = vsel %vm1356_vm2, %v1263_v11, %v1355_v15 }
 0x24f   : > { %v1295_v35 = vpop.xlane.xlu0 %1294 }
 0x251   : > { %v1293_v52 = vpop.xlane.xlu1 %1292 }
 0x252   : > { %v1374_v8 = vsel %vm1354_vm1, %v1293_v52, %v1373_v23 }
 0x253   : > { %v1375_v2 = vsel %vm1356_vm2, %v1295_v35, %v1374_v8 }
 0x257   : > { %v1267_v27 = vpop.xlane.xlu0 %1266 }
 0x25a   : > { %v1265_v18 = vpop.xlane.xlu1 %1264 }
 0x25b   : > { %v1359_v61 = vsel %vm1358_vm3, %v1265_v18, %v1357_v28 }
 0x25c   : > { %v1361_v17 = vsel %vm1360_vm4, %v1267_v27, %v1359_v61 }
 0x25d   : > { %v1299_v42 = vpop.xlane.xlu0 %1298 }
 0x262   : > { %v1303_v7 = vpop.xlane.xlu1 %1302 }
 0x265   : > { %v1297_v33 = vpop.xlane.xlu0 %1296 }
 0x266   : > { %v1376_v58 = vsel %vm1358_vm3, %v1297_v33, %v1375_v2 }
 0x267   : > { %v1377_v0 = vsel %vm1360_vm4, %v1299_v42, %v1376_v58 }
 0x26a   : > { %v1301_v53 = vpop.xlane.xlu1 %1300 }
 0x26b   : > { %v1378_v26 = vsel %vm1362_vm5, %v1301_v53, %v1377_v0 }
 0x26c   : > { %v1271_v3 = vpop.xlane.xlu0 %1270  ;;  %v1379_v5 = vsel %vm1364_vm7, %v1303_v7, %v1378_v26 }
 0x26d   : > { %1394 = vst.msk [vmem:[%s2640_s8 + $0x10] sm:$0xff] %vm1391_vm6, %v1379_v5 }
 0x271   : > { %v1307_v51 = vpop.xlane.xlu1 %1306 }
 0x274   : > { %v1269_v24 = vpop.xlane.xlu0 %1268 }
 0x275   : > { %v1363_v40 = vsel %vm1362_vm5, %v1269_v24, %v1361_v17 }
 0x276   : > { %v1365_v6 = vsel %vm1364_vm7, %v1271_v3, %v1363_v40 }
 0x277   : > { %1392 = vst.msk [vmem:[%s2640_s8] sm:$0xff] %vm1391_vm6, %v1365_v6 }
 0x278   : > { %v1273_v59 = vpop.xlane.xlu1 %1272 }
 0x27b   : > { %v1275_v21 = vpop.xlane.xlu0 %1274 }
 0x27c   : > { %v1366_v41 = vsel %vm1352_vm0, %v1275_v21, %v1273_v59 }
 0x27f   : > { %v1311_v55 = vpop.xlane.xlu1 %1310 }
 0x284   : > { %v1305_v19 = vpop.xlane.xlu0 %1304 }
 0x285   : > { %v1380_v47 = vsel %vm1352_vm0, %v1307_v51, %v1305_v19 }
 0x287   : > { %v1309_v25 = vpop.xlane.xlu1 %1308 }
 0x288   : > { %v1381_v1 = vsel %vm1354_vm1, %v1309_v25, %v1380_v47 }
 0x289   : > { %v1382_v13 = vsel %vm1356_vm2, %v1311_v55, %v1381_v1 }
 0x28a   : > { %v1279_v50 = vpop.xlane.xlu0 %1278 }
 0x28e   : > { %v1283_v39 = vpop.xlane.xlu1 %1282 }
 0x293   : > { %v1277_v4 = vpop.xlane.xlu0 %1276 }
 0x294   : > { %v1367_v63 = vsel %vm1354_vm1, %v1277_v4, %v1366_v41 }
 0x295   : > { %v1368_v56 = vsel %vm1356_vm2, %v1279_v50, %v1367_v63 }
 0x296   : > { %v1281_v34 = vpop.xlane.xlu1 %1280 }
 0x297   : > { %v1369_v44 = vsel %vm1358_vm3, %v1281_v34, %v1368_v56 }
 0x298   : > { %v1315_v9 = vpop.xlane.xlu0 %1314  ;;  %v1370_v31 = vsel %vm1360_vm4, %v1283_v39, %v1369_v44 }
 0x29d   : > { %v1313_v10 = vpop.xlane.xlu1 %1312 }
 0x29e   : > { %v1383_v43 = vsel %vm1358_vm3, %v1313_v10, %v1382_v13 }
 0x29f   : > { %v1384_v54 = vsel %vm1360_vm4, %v1315_v9, %v1383_v43 }
 0x2a3   : > { %v1287_v60 = vpop.xlane.xlu0 %1286 }
 0x2a4   : > { %v1285_v20 = vpop.xlane.xlu1 %1284 }
 0x2a5   : > { %v1371_v14 = vsel %vm1362_vm5, %v1285_v20, %v1370_v31 }
 0x2a6   : > { %v1372_v22 = vsel %vm1364_vm7, %v1287_v60, %v1371_v14 }
 0x2a7   : > { %1393 = vst.msk [vmem:[%s2640_s8 + $0x8] sm:$0xff] %vm1391_vm6, %v1372_v22  ;;  %v1317_v16 = vpop.xlane.xlu0 %1316 }
 0x2a8   : > { %v1385_v62 = vsel %vm1362_vm5, %v1317_v16, %v1384_v54 }
 0x2ac   : > { %v1319_v36 = vpop.xlane.xlu1 %1318 }
 0x2ad   : > { %v1386_v45 = vsel %vm1364_vm7, %v1319_v36, %v1385_v62 }
 0x2ae   : > { %1395 = vst.msk [vmem:[%s2640_s8 + $0x18] sm:$0xff] %vm1391_vm6, %v1386_v45 }
 0x2af PF: > { %p14_p6 = scmp.ge.s32.totalorder %s2041_s23, 4   ;;  %s2700_s12 = smov %s1960_s13 }
 0x2b0   : > { %s2701_s13 = smov %s1964_s14  ;;  %s2702_s14 = smov %s2070_s11 }
 0x2b1   : > { %s2703_s15 = smov %s2041_s23  ;;  %16 = sbr.rel (!%p14_p6) target bundleno = 4 (0x4), region = 76 }
 0x2b8   :  { %1418 = vsyncpa [#allocation3], 1 }
 0x2b9   :  { %1420 = vsyncpa [#allocation3 + $0x1], 1 }
 0x2ba   :  { %1421 = vsyncpa [#allocation5], 1 }

</bundles_post_ra>
